<compile_context>
chip_gen: v7x
topology: tpu7x:2x2x1
jax: 0.10.0
libtpu: 0.0.40
codegen_flags: <defaults>
</compile_context>

<pallas_src>
import functools

import jax
import jax.numpy as jnp
from jax.experimental import pallas as pl
from jax.experimental.pallas import tpu as pltpu

# ---------------------------------------------------------------------------
# Model hyper-parameters (small, synthetic).  Packing assumes FFN >= HIDDEN and
# FFN + 1 <= 4 * HIDDEN (true here: 64 and 128).
# ---------------------------------------------------------------------------
BATCH = 2
SEQ = 8
HIDDEN = 32
NUM_HEADS = 2
HEAD_DIM = HIDDEN // NUM_HEADS
FFN = 64
VOCAB = 100
TYPE_VOCAB = 2
LN_EPS = 1e-12


def _layer_norm(x, g, b):
    mu = jnp.mean(x, axis=-1, keepdims=True)
    var = jnp.mean((x - mu) ** 2, axis=-1, keepdims=True)
    return (x - mu) * jax.lax.rsqrt(var + LN_EPS) * g + b


def _gelu(x):
    # tanh approximation (maps onto the EUP tanh).
    c = 0.7978845608028654  # sqrt(2/pi)
    return 0.5 * x * (1.0 + jnp.tanh(c * (x + 0.044715 * x * x * x)))


# ---------------------------------------------------------------------------
# Fused Pallas kernel: embeddings-LN -> encoder layer -> pooler -> classifier.
# ---------------------------------------------------------------------------
def fused_model_kernel(x_ref, mask_ref, wpack_ref, vec_ref, o_ref,
                       *, num_heads, n_seq, seq, hidden, ffn, batch):
    H, F = hidden, ffn
    hd = H // num_heads

    # ---- unpack the two parameter slabs with static slices -----------------
    vec = vec_ref[...]                              # [8, 4H] f32
    b_qkv = vec[0:1, 0:3 * H]                       # bq | bk | bv
    b_o = vec[0:1, 3 * H:4 * H]
    ln_e_g = vec[1:2, 0:H]
    ln_e_b = vec[1:2, H:2 * H]
    ln_a_g = vec[1:2, 2 * H:3 * H]
    ln_a_b = vec[1:2, 3 * H:4 * H]
    ln_f_g = vec[2:3, 0:H]
    ln_f_b = vec[2:3, H:2 * H]
    b_2 = vec[2:3, 2 * H:3 * H]
    b_pool = vec[2:3, 3 * H:4 * H]
    b_1 = vec[3:4, 0:F]
    b_cls = vec[3:4, F:F + 1]                       # [1, 1]
    w_cls_row = vec[4:5, :]                         # [1, 4H] flattened classifier

    W = wpack_ref[...]                              # [F, 8H] bf16
    w_qkv = W[0:H, 0:3 * H]                         # [H, 3H]
    w_o = W[0:H, 3 * H:4 * H]                       # [H, H]
    w_1 = W[0:H, 4 * H:4 * H + F]                   # [H, F]
    w_pool = W[0:H, 4 * H + F:5 * H + F]            # [H, H]
    w_2 = W[0:F, 7 * H:8 * H]                       # [F, H]

    # ---- embedding LayerNorm (f32) -----------------------------------------
    x = x_ref[...]                                  # [N*S, H] f32
    h = _layer_norm(x, ln_e_g, ln_e_b)

    # ---- fused QKV projection (bf16 MXU, f32 accumulate) -------------------
    qkv = jnp.dot(h.astype(jnp.bfloat16), w_qkv,
                  preferred_element_type=jnp.float32) + b_qkv       # [N*S, 3H]

    q3 = qkv[:, 0:H].reshape(n_seq, seq, H)
    k3 = qkv[:, H:2 * H].reshape(n_seq, seq, H)
    v3 = qkv[:, 2 * H:3 * H].reshape(n_seq, seq, H)

    # Fold heads into the batch axis: [num_heads * N, S, head_dim].
    qh = jnp.concatenate([q3[:, :, i * hd:(i + 1) * hd] for i in range(num_heads)], axis=0)
    kh = jnp.concatenate([k3[:, :, i * hd:(i + 1) * hd] for i in range(num_heads)], axis=0)
    vh = jnp.concatenate([v3[:, :, i * hd:(i + 1) * hd] for i in range(num_heads)], axis=0)

    mask = mask_ref[...]                                            # [N, S]
    bias = (1.0 - mask) * -1e9
    bias = jnp.concatenate([bias] * num_heads, axis=0)[:, None, :]  # [hN, 1, S]

    scale = 1.0 / jnp.sqrt(jnp.float32(hd))
    s = jnp.einsum('bqd,bkd->bqk', qh, kh,
                   preferred_element_type=jnp.float32) * scale + bias
    m = jnp.max(s, axis=-1, keepdims=True)
    p = jnp.exp(s - m)
    p = p * pl.reciprocal(jnp.sum(p, axis=-1, keepdims=True), approx=True)
    ctx_h = jnp.einsum('bqk,bkd->bqd', p, vh,
                       preferred_element_type=jnp.float32)          # [hN, S, hd]

    # Un-fold heads back onto the lane axis, flatten tokens.
    ctx = jnp.concatenate(
        [ctx_h[i * n_seq:(i + 1) * n_seq] for i in range(num_heads)],
        axis=-1).reshape(n_seq * seq, H)                            # [N*S, H]

    attn = jnp.dot(ctx.astype(jnp.bfloat16), w_o,
                   preferred_element_type=jnp.float32) + b_o
    h1 = _layer_norm(h + attn, ln_a_g, ln_a_b)

    ff = _gelu(jnp.dot(h1.astype(jnp.bfloat16), w_1,
                       preferred_element_type=jnp.float32) + b_1)
    ff = jnp.dot(ff.astype(jnp.bfloat16), w_2,
                 preferred_element_type=jnp.float32) + b_2
    h2 = _layer_norm(h1 + ff, ln_f_g, ln_f_b)                       # [N*S, H]

    # ---- CLS pooler + classifier (fused) ------------------------------------
    cls = h2.reshape(n_seq, seq, H)[:, 0, :]                        # [N, H]
    pooled = jnp.tanh(jnp.dot(cls.astype(jnp.bfloat16), w_pool,
                              preferred_element_type=jnp.float32) + b_pool)  # [N, H]
    # [AA | AD | RA | RD] pooled features -> [B, 4H] lane-dense slab.
    feats = jnp.concatenate(
        [pooled[i * batch:(i + 1) * batch] for i in range(4)], axis=-1)      # [B, 4H]
    logits = jnp.sum(feats * w_cls_row, axis=-1, keepdims=True) + b_cls      # [B, 1]
    o_ref[...] = logits


def run_fused_model(x_flat, mask, w_pack, vec):
    vmem = pl.BlockSpec(memory_space=pltpu.MemorySpace.VMEM)
    kern = functools.partial(
        fused_model_kernel, num_heads=NUM_HEADS, n_seq=4 * BATCH,
        seq=SEQ, hidden=HIDDEN, ffn=FFN, batch=BATCH)
    return pl.pallas_call(
        kern,
        out_shape=jax.ShapeDtypeStruct((BATCH, 1), jnp.float32),
        in_specs=[vmem] * 4,
        out_specs=vmem,
    )(x_flat, mask, w_pack, vec)


# ---------------------------------------------------------------------------
# Deterministic parameter initialization + packing.
# ---------------------------------------------------------------------------
def init_params(key):
    ks = jax.random.split(key, 24)
    H, F = HIDDEN, FFN
    norm = lambda k, shape, s=0.02: (s * jax.random.normal(k, shape)).astype(jnp.float32)
    return {
        'word_emb': norm(ks[0], (VOCAB, H)),
        'type_emb': norm(ks[1], (TYPE_VOCAB, H)),
        'pos_emb': norm(ks[2], (SEQ, H)),
        'ln_e_g': (1.0 + 0.02 * jax.random.normal(ks[3], (H,))).astype(jnp.float32),
        'ln_e_b': norm(ks[4], (H,)),
        'wq': norm(ks[5], (H, H)), 'bq': norm(ks[6], (H,)),
        'wk': norm(ks[7], (H, H)), 'bk': norm(ks[8], (H,)),
        'wv': norm(ks[9], (H, H)), 'bv': norm(ks[10], (H,)),
        'wo': norm(ks[11], (H, H)), 'bo': norm(ks[12], (H,)),
        'ln_a_g': (1.0 + 0.02 * jax.random.normal(ks[13], (H,))).astype(jnp.float32),
        'ln_a_b': norm(ks[14], (H,)),
        'w1': norm(ks[15], (H, F)), 'b1': norm(ks[16], (F,)),
        'w2': norm(ks[17], (F, H)), 'b2': norm(ks[18], (H,)),
        'ln_f_g': (1.0 + 0.02 * jax.random.normal(ks[19], (H,))).astype(jnp.float32),
        'ln_f_b': norm(ks[20], (H,)),
        'pooler_w': norm(ks[21], (H, H)), 'pooler_b': norm(ks[22], (H,)),
        'cls_w': norm(ks[23], (4 * H, 1)), 'cls_b': jnp.zeros((1,), jnp.float32),
    }


def pack_params(p):
    """Pack all encoder/pooler/classifier params into 2 slabs (bf16 weights, f32 vectors)."""
    H, F = HIDDEN, FFN
    w_main = jnp.concatenate(
        [p['wq'], p['wk'], p['wv'], p['wo'], p['w1'], p['pooler_w']], axis=1)   # [H, 7H]
    w_pack = jnp.zeros((F, 8 * H), jnp.float32)
    w_pack = w_pack.at[0:H, 0:7 * H].set(w_main)
    w_pack = w_pack.at[0:F, 7 * H:8 * H].set(p['w2'])
    w_pack = w_pack.astype(jnp.bfloat16)

    vec = jnp.zeros((8, 4 * H), jnp.float32)
    vec = vec.at[0, 0:H].set(p['bq'])
    vec = vec.at[0, H:2 * H].set(p['bk'])
    vec = vec.at[0, 2 * H:3 * H].set(p['bv'])
    vec = vec.at[0, 3 * H:4 * H].set(p['bo'])
    vec = vec.at[1, 0:H].set(p['ln_e_g'])
    vec = vec.at[1, H:2 * H].set(p['ln_e_b'])
    vec = vec.at[1, 2 * H:3 * H].set(p['ln_a_g'])
    vec = vec.at[1, 3 * H:4 * H].set(p['ln_a_b'])
    vec = vec.at[2, 0:H].set(p['ln_f_g'])
    vec = vec.at[2, H:2 * H].set(p['ln_f_b'])
    vec = vec.at[2, 2 * H:3 * H].set(p['b2'])
    vec = vec.at[2, 3 * H:4 * H].set(p['pooler_b'])
    vec = vec.at[3, 0:F].set(p['b1'])
    vec = vec.at[3, F:F + 1].set(p['cls_b'])
    vec = vec.at[4, :].set(p['cls_w'][:, 0])

    return {'word_emb': p['word_emb'], 'type_emb': p['type_emb'],
            'pos_emb': p['pos_emb'], 'w_pack': w_pack, 'vec': vec}


# ---------------------------------------------------------------------------
# Forward pass mirroring MyModelWrapper.forward's 12-argument signature.
# ---------------------------------------------------------------------------
@jax.jit
def my_model_forward(packed,
                     AA_input_ids, AA_token_type_ids, AA_attention_mask,
                     AD_input_ids, AD_token_type_ids, AD_attention_mask,
                     RA_input_ids, RA_token_type_ids, RA_attention_mask,
                     RD_input_ids, RD_token_type_ids, RD_attention_mask):
    input_ids = jnp.concatenate(
        [AA_input_ids, AD_input_ids, RA_input_ids, RD_input_ids], axis=0)
    token_type_ids = jnp.concatenate(
        [AA_token_type_ids, AD_token_type_ids, RA_token_type_ids, RD_token_type_ids], axis=0)
    attention_mask = jnp.concatenate(
        [AA_attention_mask, AD_attention_mask, RA_attention_mask, RD_attention_mask], axis=0)

    # TODO(synk): embedding table gathers stay in XLA (no dense Pallas gather needed here).
    x = (packed['word_emb'][input_ids]
         + packed['type_emb'][token_type_ids]
         + packed['pos_emb'][None, :, :]).astype(jnp.float32)        # [4B, S, H]
    x_flat = x.reshape(4 * BATCH * SEQ, HIDDEN)                       # [N*S, H]
    mask = attention_mask.astype(jnp.float32)                         # [4B, S]

    return run_fused_model(x_flat, mask, packed['w_pack'], packed['vec'])   # [B, 1]


# ---------------------------------------------------------------------------
# Pure-JAX float32 reference (for a numerical sanity check).
# ---------------------------------------------------------------------------
def reference_forward(p, *args):
    (AA_ids, AA_tt, AA_am, AD_ids, AD_tt, AD_am,
     RA_ids, RA_tt, RA_am, RD_ids, RD_tt, RD_am) = args
    ids = jnp.concatenate([AA_ids, AD_ids, RA_ids, RD_ids], axis=0)
    tts = jnp.concatenate([AA_tt, AD_tt, RA_tt, RD_tt], axis=0)
    ams = jnp.concatenate([AA_am, AD_am, RA_am, RD_am], axis=0)
    x = p['word_emb'][ids] + p['type_emb'][tts] + p['pos_emb'][None]
    mask = ams.astype(jnp.float32)

    h = _layer_norm(x, p['ln_e_g'], p['ln_e_b'])
    q = h @ p['wq'] + p['bq']
    k = h @ p['wk'] + p['bk']
    v = h @ p['wv'] + p['bv']
    bias = ((1.0 - mask) * -1e9)[:, None, :]
    ctxs = []
    for i in range(NUM_HEADS):
        sl = slice(i * HEAD_DIM, (i + 1) * HEAD_DIM)
        s = jnp.einsum('bqd,bkd->bqk', q[..., sl], k[..., sl]) / jnp.sqrt(float(HEAD_DIM)) + bias
        pr = jax.nn.softmax(s, axis=-1)
        ctxs.append(jnp.einsum('bqk,bkd->bqd', pr, v[..., sl]))
    ctx = jnp.concatenate(ctxs, axis=-1)
    h1 = _layer_norm(h + ctx @ p['wo'] + p['bo'], p['ln_a_g'], p['ln_a_b'])
    ffn = _gelu(h1 @ p['w1'] + p['b1']) @ p['w2'] + p['b2']
    h2 = _layer_norm(h1 + ffn, p['ln_f_g'], p['ln_f_b'])
    cls = h2[:, 0, :]
    pooled = jnp.tanh(cls @ p['pooler_w'] + p['pooler_b']).reshape(4, BATCH, HIDDEN)
    feats = jnp.concatenate([pooled[0], pooled[1], pooled[2], pooled[3]], axis=-1)
    return feats @ p['cls_w'] + p['cls_b']


# ---------------------------------------------------------------------------
if __name__ == "__main__":
    root = jax.random.PRNGKey(0)
    pkey, dkey = jax.random.split(root)
    raw_params = init_params(pkey)
    packed_params = pack_params(raw_params)

    def make_inputs(k):
        k1, k2 = jax.random.split(k)
        ids = jax.random.randint(k1, (BATCH, SEQ), 0, VOCAB, dtype=jnp.int32)
        tt = jax.random.randint(k2, (BATCH, SEQ), 0, TYPE_VOCAB, dtype=jnp.int32)
        am = jnp.ones((BATCH, SEQ), jnp.int32).at[0, -1].set(0)   # one padded position
        return ids, tt, am

    kAA, kAD, kRA, kRD = jax.random.split(dkey, 4)
    AA, AD, RA, RD = make_inputs(kAA), make_inputs(kAD), make_inputs(kRA), make_inputs(kRD)

    out = my_model_forward(packed_params, *AA, *AD, *RA, *RD)
    out = jax.block_until_ready(out)
    assert out.shape == (BATCH, 1) and out.dtype == jnp.float32

    ref = reference_forward(raw_params, *AA, *AD, *RA, *RD)
    max_err = float(jnp.max(jnp.abs(out - ref)))
    assert max_err < 5e-3, f"kernel deviates from f32 reference: {max_err}"

    print("KERNEL_OK")
</pallas_src>

<mosaic_0001>
module attributes {stable_mosaic.version = 11 : i64} {
  func.func @fused_model_kernel(%arg0: memref<64x32xf32, #tpu.memory_space<vmem>>, %arg1: memref<8x8xf32, #tpu.memory_space<vmem>>, %arg2: memref<64x256xbf16, #tpu.memory_space<vmem>>, %arg3: memref<8x128xf32, #tpu.memory_space<vmem>>, %arg4: memref<2x1xf32, #tpu.memory_space<vmem>>) attributes {dimension_semantics = [], scalar_prefetch = 0 : i64, scratch_operands = 0 : i64, tpu.core_type = #tpu.core_type<tc>} {
    %c0 = arith.constant 0 : index
    %c0_0 = arith.constant 0 : index
    %0 = vector.load %arg3[%c0, %c0_0] : memref<8x128xf32, #tpu.memory_space<vmem>>, vector<8x128xf32>
    %1 = vector.extract_strided_slice %0 {offsets = [0, 0], sizes = [1, 96], strides = [1, 1]} : vector<8x128xf32> to vector<1x96xf32>
    %2 = vector.extract_strided_slice %0 {offsets = [0, 96], sizes = [1, 32], strides = [1, 1]} : vector<8x128xf32> to vector<1x32xf32>
    %3 = vector.extract_strided_slice %0 {offsets = [1, 0], sizes = [1, 32], strides = [1, 1]} : vector<8x128xf32> to vector<1x32xf32>
    %4 = vector.extract_strided_slice %0 {offsets = [1, 32], sizes = [1, 32], strides = [1, 1]} : vector<8x128xf32> to vector<1x32xf32>
    %5 = vector.extract_strided_slice %0 {offsets = [1, 64], sizes = [1, 32], strides = [1, 1]} : vector<8x128xf32> to vector<1x32xf32>
    %6 = vector.extract_strided_slice %0 {offsets = [1, 96], sizes = [1, 32], strides = [1, 1]} : vector<8x128xf32> to vector<1x32xf32>
    %7 = vector.extract_strided_slice %0 {offsets = [2, 0], sizes = [1, 32], strides = [1, 1]} : vector<8x128xf32> to vector<1x32xf32>
    %8 = vector.extract_strided_slice %0 {offsets = [2, 32], sizes = [1, 32], strides = [1, 1]} : vector<8x128xf32> to vector<1x32xf32>
    %9 = vector.extract_strided_slice %0 {offsets = [2, 64], sizes = [1, 32], strides = [1, 1]} : vector<8x128xf32> to vector<1x32xf32>
    %10 = vector.extract_strided_slice %0 {offsets = [2, 96], sizes = [1, 32], strides = [1, 1]} : vector<8x128xf32> to vector<1x32xf32>
    %11 = vector.extract_strided_slice %0 {offsets = [3, 0], sizes = [1, 64], strides = [1, 1]} : vector<8x128xf32> to vector<1x64xf32>
    %12 = vector.extract_strided_slice %0 {offsets = [3, 64], sizes = [1, 1], strides = [1, 1]} : vector<8x128xf32> to vector<1x1xf32>
    %13 = vector.extract_strided_slice %0 {offsets = [4, 0], sizes = [1, 128], strides = [1, 1]} : vector<8x128xf32> to vector<1x128xf32>
    %c0_1 = arith.constant 0 : index
    %c0_2 = arith.constant 0 : index
    %14 = vector.load %arg2[%c0_1, %c0_2] : memref<64x256xbf16, #tpu.memory_space<vmem>>, vector<64x256xbf16>
    %15 = vector.extract_strided_slice %14 {offsets = [0, 0], sizes = [32, 96], strides = [1, 1]} : vector<64x256xbf16> to vector<32x96xbf16>
    %16 = vector.extract_strided_slice %14 {offsets = [0, 96], sizes = [32, 32], strides = [1, 1]} : vector<64x256xbf16> to vector<32x32xbf16>
    %17 = vector.extract_strided_slice %14 {offsets = [0, 128], sizes = [32, 64], strides = [1, 1]} : vector<64x256xbf16> to vector<32x64xbf16>
    %18 = vector.extract_strided_slice %14 {offsets = [0, 192], sizes = [32, 32], strides = [1, 1]} : vector<64x256xbf16> to vector<32x32xbf16>
    %19 = vector.extract_strided_slice %14 {offsets = [0, 224], sizes = [64, 32], strides = [1, 1]} : vector<64x256xbf16> to vector<64x32xbf16>
    %c0_3 = arith.constant 0 : index
    %c0_4 = arith.constant 0 : index
    %20 = vector.load %arg0[%c0_3, %c0_4] : memref<64x32xf32, #tpu.memory_space<vmem>>, vector<64x32xf32>
    %cst = arith.constant dense<0.000000e+00> : vector<64xf32>
    %21 = vector.multi_reduction <add>, %20, %cst [1] : vector<64x32xf32> to vector<64xf32>
    %22 = vector.shape_cast %21 : vector<64xf32> to vector<64x1xf32>
    %cst_5 = arith.constant 3.200000e+01 : f32
    %23 = vector.broadcast %cst_5 : f32 to vector<64x1xf32>
    %24 = arith.divf %22, %23 : vector<64x1xf32>
    %25 = vector.broadcast %24 : vector<64x1xf32> to vector<64x32xf32>
    %26 = arith.subf %20, %25 : vector<64x32xf32>
    %27 = arith.mulf %26, %26 : vector<64x32xf32>
    %cst_6 = arith.constant dense<0.000000e+00> : vector<64xf32>
    %28 = vector.multi_reduction <add>, %27, %cst_6 [1] : vector<64x32xf32> to vector<64xf32>
    %29 = vector.shape_cast %28 : vector<64xf32> to vector<64x1xf32>
    %cst_7 = arith.constant 3.200000e+01 : f32
    %30 = vector.broadcast %cst_7 : f32 to vector<64x1xf32>
    %31 = arith.divf %29, %30 : vector<64x1xf32>
    %32 = vector.broadcast %24 : vector<64x1xf32> to vector<64x32xf32>
    %33 = arith.subf %20, %32 : vector<64x32xf32>
    %cst_8 = arith.constant 9.99999996E-13 : f32
    %34 = vector.broadcast %cst_8 : f32 to vector<64x1xf32>
    %35 = arith.addf %31, %34 : vector<64x1xf32>
    %36 = math.rsqrt %35 : vector<64x1xf32>
    %37 = vector.broadcast %36 : vector<64x1xf32> to vector<64x32xf32>
    %38 = arith.mulf %33, %37 : vector<64x32xf32>
    %39 = vector.broadcast %3 : vector<1x32xf32> to vector<64x32xf32>
    %40 = arith.mulf %38, %39 : vector<64x32xf32>
    %41 = vector.broadcast %4 : vector<1x32xf32> to vector<64x32xf32>
    %42 = arith.addf %40, %41 : vector<64x32xf32>
    %43 = arith.truncf %42 : vector<64x32xf32> to vector<64x32xbf16>
    %cst_9 = arith.constant dense<0.000000e+00> : vector<64x96xf32>
    %44 = tpu.matmul %43, %15, %cst_9 {dimension_numbers = #tpu.dot_dimension_numbers<[1], [0], [0], [1], [0, 0, 1, 1], [], []>} : vector<64x32xbf16>, vector<32x96xbf16>, vector<64x96xf32> -> vector<64x96xf32>
    %45 = vector.broadcast %1 : vector<1x96xf32> to vector<64x96xf32>
    %46 = arith.addf %44, %45 : vector<64x96xf32>
    %47 = vector.extract_strided_slice %46 {offsets = [0, 0], sizes = [64, 32], strides = [1, 1]} : vector<64x96xf32> to vector<64x32xf32>
    %48 = vector.shape_cast %47 : vector<64x32xf32> to vector<8x8x32xf32>
    %49 = vector.extract_strided_slice %46 {offsets = [0, 32], sizes = [64, 32], strides = [1, 1]} : vector<64x96xf32> to vector<64x32xf32>
    %50 = vector.shape_cast %49 : vector<64x32xf32> to vector<8x8x32xf32>
    %51 = vector.extract_strided_slice %46 {offsets = [0, 64], sizes = [64, 32], strides = [1, 1]} : vector<64x96xf32> to vector<64x32xf32>
    %52 = vector.shape_cast %51 : vector<64x32xf32> to vector<8x8x32xf32>
    %53 = vector.extract_strided_slice %48 {offsets = [0, 0, 0], sizes = [8, 8, 16], strides = [1, 1, 1]} : vector<8x8x32xf32> to vector<8x8x16xf32>
    %54 = vector.extract_strided_slice %48 {offsets = [0, 0, 16], sizes = [8, 8, 16], strides = [1, 1, 1]} : vector<8x8x32xf32> to vector<8x8x16xf32>
    %55 = tpu.concatenate %53, %54 in 0 : vector<8x8x16xf32>, vector<8x8x16xf32> -> vector<16x8x16xf32>
    %56 = vector.extract_strided_slice %50 {offsets = [0, 0, 0], sizes = [8, 8, 16], strides = [1, 1, 1]} : vector<8x8x32xf32> to vector<8x8x16xf32>
    %57 = vector.extract_strided_slice %50 {offsets = [0, 0, 16], sizes = [8, 8, 16], strides = [1, 1, 1]} : vector<8x8x32xf32> to vector<8x8x16xf32>
    %58 = tpu.concatenate %56, %57 in 0 : vector<8x8x16xf32>, vector<8x8x16xf32> -> vector<16x8x16xf32>
    %59 = vector.extract_strided_slice %52 {offsets = [0, 0, 0], sizes = [8, 8, 16], strides = [1, 1, 1]} : vector<8x8x32xf32> to vector<8x8x16xf32>
    %60 = vector.extract_strided_slice %52 {offsets = [0, 0, 16], sizes = [8, 8, 16], strides = [1, 1, 1]} : vector<8x8x32xf32> to vector<8x8x16xf32>
    %61 = tpu.concatenate %59, %60 in 0 : vector<8x8x16xf32>, vector<8x8x16xf32> -> vector<16x8x16xf32>
    %c0_10 = arith.constant 0 : index
    %c0_11 = arith.constant 0 : index
    %62 = vector.load %arg1[%c0_10, %c0_11] : memref<8x8xf32, #tpu.memory_space<vmem>>, vector<8x8xf32>
    %cst_12 = arith.constant 1.000000e+00 : f32
    %63 = vector.broadcast %cst_12 : f32 to vector<8x8xf32>
    %64 = arith.subf %63, %62 : vector<8x8xf32>
    %cst_13 = arith.constant -1.000000e+09 : f32
    %65 = vector.broadcast %cst_13 : f32 to vector<8x8xf32>
    %66 = arith.mulf %64, %65 : vector<8x8xf32>
    %67 = tpu.concatenate %66, %66 in 0 : vector<8x8xf32>, vector<8x8xf32> -> vector<16x8xf32>
    %68 = vector.shape_cast %67 : vector<16x8xf32> to vector<16x1x8xf32>
    %cst_14 = arith.constant 1.600000e+01 : f32
    %69 = math.sqrt %cst_14 : f32
    %cst_15 = arith.constant 1.000000e+00 : f32
    %70 = arith.divf %cst_15, %69 : f32
    "tpu.trace_start"() <{level = 10 : i32, message = "bqd,bkd->bqk"}> : () -> ()
    %cst_16 = arith.constant dense<0.000000e+00> : vector<16x8x8xf32>
    %71 = tpu.matmul %55, %58, %cst_16 {dimension_numbers = #tpu.dot_dimension_numbers<[2], [2], [1], [1], [0, 0, 0, 1, 1, 1], [0], [0]>} : vector<16x8x16xf32>, vector<16x8x16xf32>, vector<16x8x8xf32> -> vector<16x8x8xf32>
    "tpu.trace_stop"() : () -> ()
    %72 = vector.broadcast %70 : f32 to vector<16x8x8xf32>
    %73 = arith.mulf %71, %72 : vector<16x8x8xf32>
    %74 = vector.broadcast %68 : vector<16x1x8xf32> to vector<16x8x8xf32>
    %75 = arith.addf %73, %74 : vector<16x8x8xf32>
    %cst_17 = arith.constant dense<0xFF800000> : vector<16x8xf32>
    %76 = vector.multi_reduction <maximumf>, %75, %cst_17 [2] : vector<16x8x8xf32> to vector<16x8xf32>
    %77 = vector.shape_cast %76 : vector<16x8xf32> to vector<16x8x1xf32>
    %78 = vector.broadcast %77 : vector<16x8x1xf32> to vector<16x8x8xf32>
    %79 = arith.subf %75, %78 : vector<16x8x8xf32>
    %80 = math.exp %79 : vector<16x8x8xf32>
    %cst_18 = arith.constant dense<0.000000e+00> : vector<16x8xf32>
    %81 = vector.multi_reduction <add>, %80, %cst_18 [2] : vector<16x8x8xf32> to vector<16x8xf32>
    %82 = vector.shape_cast %81 : vector<16x8xf32> to vector<16x8x1xf32>
    %83 = tpu.reciprocal %82 {approx = true} : vector<16x8x1xf32> -> vector<16x8x1xf32>
    %84 = vector.broadcast %83 : vector<16x8x1xf32> to vector<16x8x8xf32>
    %85 = arith.mulf %80, %84 : vector<16x8x8xf32>
    "tpu.trace_start"() <{level = 10 : i32, message = "bqk,bkd->bqd"}> : () -> ()
    %cst_19 = arith.constant dense<0.000000e+00> : vector<16x8x16xf32>
    %86 = tpu.matmul %85, %61, %cst_19 {dimension_numbers = #tpu.dot_dimension_numbers<[2], [1], [1], [2], [0, 0, 0, 1, 1, 2], [0], [0]>} : vector<16x8x8xf32>, vector<16x8x16xf32>, vector<16x8x16xf32> -> vector<16x8x16xf32>
    "tpu.trace_stop"() : () -> ()
    %87 = vector.extract_strided_slice %86 {offsets = [0, 0, 0], sizes = [8, 8, 16], strides = [1, 1, 1]} : vector<16x8x16xf32> to vector<8x8x16xf32>
    %88 = vector.extract_strided_slice %86 {offsets = [8, 0, 0], sizes = [8, 8, 16], strides = [1, 1, 1]} : vector<16x8x16xf32> to vector<8x8x16xf32>
    %89 = tpu.concatenate %87, %88 in 2 : vector<8x8x16xf32>, vector<8x8x16xf32> -> vector<8x8x32xf32>
    %90 = vector.shape_cast %89 : vector<8x8x32xf32> to vector<64x32xf32>
    %91 = arith.truncf %90 : vector<64x32xf32> to vector<64x32xbf16>
    %cst_20 = arith.constant dense<0.000000e+00> : vector<64x32xf32>
    %92 = tpu.matmul %91, %16, %cst_20 {dimension_numbers = #tpu.dot_dimension_numbers<[1], [0], [0], [1], [0, 0, 1, 1], [], []>} : vector<64x32xbf16>, vector<32x32xbf16>, vector<64x32xf32> -> vector<64x32xf32>
    %93 = vector.broadcast %2 : vector<1x32xf32> to vector<64x32xf32>
    %94 = arith.addf %92, %93 : vector<64x32xf32>
    %95 = arith.addf %42, %94 : vector<64x32xf32>
    %cst_21 = arith.constant dense<0.000000e+00> : vector<64xf32>
    %96 = vector.multi_reduction <add>, %95, %cst_21 [1] : vector<64x32xf32> to vector<64xf32>
    %97 = vector.shape_cast %96 : vector<64xf32> to vector<64x1xf32>
    %cst_22 = arith.constant 3.200000e+01 : f32
    %98 = vector.broadcast %cst_22 : f32 to vector<64x1xf32>
    %99 = arith.divf %97, %98 : vector<64x1xf32>
    %100 = vector.broadcast %99 : vector<64x1xf32> to vector<64x32xf32>
    %101 = arith.subf %95, %100 : vector<64x32xf32>
    %102 = arith.mulf %101, %101 : vector<64x32xf32>
    %cst_23 = arith.constant dense<0.000000e+00> : vector<64xf32>
    %103 = vector.multi_reduction <add>, %102, %cst_23 [1] : vector<64x32xf32> to vector<64xf32>
    %104 = vector.shape_cast %103 : vector<64xf32> to vector<64x1xf32>
    %cst_24 = arith.constant 3.200000e+01 : f32
    %105 = vector.broadcast %cst_24 : f32 to vector<64x1xf32>
    %106 = arith.divf %104, %105 : vector<64x1xf32>
    %107 = vector.broadcast %99 : vector<64x1xf32> to vector<64x32xf32>
    %108 = arith.subf %95, %107 : vector<64x32xf32>
    %cst_25 = arith.constant 9.99999996E-13 : f32
    %109 = vector.broadcast %cst_25 : f32 to vector<64x1xf32>
    %110 = arith.addf %106, %109 : vector<64x1xf32>
    %111 = math.rsqrt %110 : vector<64x1xf32>
    %112 = vector.broadcast %111 : vector<64x1xf32> to vector<64x32xf32>
    %113 = arith.mulf %108, %112 : vector<64x32xf32>
    %114 = vector.broadcast %5 : vector<1x32xf32> to vector<64x32xf32>
    %115 = arith.mulf %113, %114 : vector<64x32xf32>
    %116 = vector.broadcast %6 : vector<1x32xf32> to vector<64x32xf32>
    %117 = arith.addf %115, %116 : vector<64x32xf32>
    %118 = arith.truncf %117 : vector<64x32xf32> to vector<64x32xbf16>
    %cst_26 = arith.constant dense<0.000000e+00> : vector<64x64xf32>
    %119 = tpu.matmul %118, %17, %cst_26 {dimension_numbers = #tpu.dot_dimension_numbers<[1], [0], [0], [1], [0, 0, 1, 1], [], []>} : vector<64x32xbf16>, vector<32x64xbf16>, vector<64x64xf32> -> vector<64x64xf32>
    %120 = vector.broadcast %11 : vector<1x64xf32> to vector<64x64xf32>
    %121 = arith.addf %119, %120 : vector<64x64xf32>
    %cst_27 = arith.constant 5.000000e-01 : f32
    %122 = vector.broadcast %cst_27 : f32 to vector<64x64xf32>
    %123 = arith.mulf %122, %121 : vector<64x64xf32>
    %cst_28 = arith.constant 4.471500e-02 : f32
    %124 = vector.broadcast %cst_28 : f32 to vector<64x64xf32>
    %125 = arith.mulf %124, %121 : vector<64x64xf32>
    %126 = arith.mulf %125, %121 : vector<64x64xf32>
    %127 = arith.mulf %126, %121 : vector<64x64xf32>
    %128 = arith.addf %121, %127 : vector<64x64xf32>
    %cst_29 = arith.constant 0.797884583 : f32
    %129 = vector.broadcast %cst_29 : f32 to vector<64x64xf32>
    %130 = arith.mulf %129, %128 : vector<64x64xf32>
    %131 = math.tanh %130 : vector<64x64xf32>
    %cst_30 = arith.constant 1.000000e+00 : f32
    %132 = vector.broadcast %cst_30 : f32 to vector<64x64xf32>
    %133 = arith.addf %132, %131 : vector<64x64xf32>
    %134 = arith.mulf %123, %133 : vector<64x64xf32>
    %135 = arith.truncf %134 : vector<64x64xf32> to vector<64x64xbf16>
    %cst_31 = arith.constant dense<0.000000e+00> : vector<64x32xf32>
    %136 = tpu.matmul %135, %19, %cst_31 {dimension_numbers = #tpu.dot_dimension_numbers<[1], [0], [0], [1], [0, 0, 1, 1], [], []>} : vector<64x64xbf16>, vector<64x32xbf16>, vector<64x32xf32> -> vector<64x32xf32>
    %137 = vector.broadcast %9 : vector<1x32xf32> to vector<64x32xf32>
    %138 = arith.addf %136, %137 : vector<64x32xf32>
    %139 = arith.addf %117, %138 : vector<64x32xf32>
    %cst_32 = arith.constant dense<0.000000e+00> : vector<64xf32>
    %140 = vector.multi_reduction <add>, %139, %cst_32 [1] : vector<64x32xf32> to vector<64xf32>
    %141 = vector.shape_cast %140 : vector<64xf32> to vector<64x1xf32>
    %cst_33 = arith.constant 3.200000e+01 : f32
    %142 = vector.broadcast %cst_33 : f32 to vector<64x1xf32>
    %143 = arith.divf %141, %142 : vector<64x1xf32>
    %144 = vector.broadcast %143 : vector<64x1xf32> to vector<64x32xf32>
    %145 = arith.subf %139, %144 : vector<64x32xf32>
    %146 = arith.mulf %145, %145 : vector<64x32xf32>
    %cst_34 = arith.constant dense<0.000000e+00> : vector<64xf32>
    %147 = vector.multi_reduction <add>, %146, %cst_34 [1] : vector<64x32xf32> to vector<64xf32>
    %148 = vector.shape_cast %147 : vector<64xf32> to vector<64x1xf32>
    %cst_35 = arith.constant 3.200000e+01 : f32
    %149 = vector.broadcast %cst_35 : f32 to vector<64x1xf32>
    %150 = arith.divf %148, %149 : vector<64x1xf32>
    %151 = vector.broadcast %143 : vector<64x1xf32> to vector<64x32xf32>
    %152 = arith.subf %139, %151 : vector<64x32xf32>
    %cst_36 = arith.constant 9.99999996E-13 : f32
    %153 = vector.broadcast %cst_36 : f32 to vector<64x1xf32>
    %154 = arith.addf %150, %153 : vector<64x1xf32>
    %155 = math.rsqrt %154 : vector<64x1xf32>
    %156 = vector.broadcast %155 : vector<64x1xf32> to vector<64x32xf32>
    %157 = arith.mulf %152, %156 : vector<64x32xf32>
    %158 = vector.broadcast %7 : vector<1x32xf32> to vector<64x32xf32>
    %159 = arith.mulf %157, %158 : vector<64x32xf32>
    %160 = vector.broadcast %8 : vector<1x32xf32> to vector<64x32xf32>
    %161 = arith.addf %159, %160 : vector<64x32xf32>
    %162 = vector.shape_cast %161 : vector<64x32xf32> to vector<8x8x32xf32>
    %163 = vector.extract_strided_slice %162 {offsets = [0, 0, 0], sizes = [8, 1, 32], strides = [1, 1, 1]} : vector<8x8x32xf32> to vector<8x1x32xf32>
    %164 = vector.shape_cast %163 : vector<8x1x32xf32> to vector<8x32xf32>
    %165 = arith.truncf %164 : vector<8x32xf32> to vector<8x32xbf16>
    %cst_37 = arith.constant dense<0.000000e+00> : vector<8x32xf32>
    %166 = tpu.matmul %165, %18, %cst_37 {dimension_numbers = #tpu.dot_dimension_numbers<[1], [0], [0], [1], [0, 0, 1, 1], [], []>} : vector<8x32xbf16>, vector<32x32xbf16>, vector<8x32xf32> -> vector<8x32xf32>
    %167 = vector.broadcast %10 : vector<1x32xf32> to vector<8x32xf32>
    %168 = arith.addf %166, %167 : vector<8x32xf32>
    %169 = math.tanh %168 : vector<8x32xf32>
    %170 = vector.extract_strided_slice %169 {offsets = [0, 0], sizes = [2, 32], strides = [1, 1]} : vector<8x32xf32> to vector<2x32xf32>
    %171 = vector.extract_strided_slice %169 {offsets = [2, 0], sizes = [2, 32], strides = [1, 1]} : vector<8x32xf32> to vector<2x32xf32>
    %172 = vector.extract_strided_slice %169 {offsets = [4, 0], sizes = [2, 32], strides = [1, 1]} : vector<8x32xf32> to vector<2x32xf32>
    %173 = vector.extract_strided_slice %169 {offsets = [6, 0], sizes = [2, 32], strides = [1, 1]} : vector<8x32xf32> to vector<2x32xf32>
    %174 = tpu.concatenate %170, %171, %172, %173 in 1 : vector<2x32xf32>, vector<2x32xf32>, vector<2x32xf32>, vector<2x32xf32> -> vector<2x128xf32>
    %175 = vector.broadcast %13 : vector<1x128xf32> to vector<2x128xf32>
    %176 = arith.mulf %174, %175 : vector<2x128xf32>
    %cst_38 = arith.constant dense<0.000000e+00> : vector<2xf32>
    %177 = vector.multi_reduction <add>, %176, %cst_38 [1] : vector<2x128xf32> to vector<2xf32>
    %178 = vector.shape_cast %177 : vector<2xf32> to vector<2x1xf32>
    %179 = vector.broadcast %12 : vector<1x1xf32> to vector<2x1xf32>
    %180 = arith.addf %178, %179 : vector<2x1xf32>
    %c0_39 = arith.constant 0 : index
    %c0_40 = arith.constant 0 : index
    %181 = vector.load %arg4[%c0_39, %c0_40] : memref<2x1xf32, #tpu.memory_space<vmem>>, vector<2x1xf32>
    tpu.vector_store %arg4[%c0_39, %c0_40], %180 {strides = array<i32>} : memref<2x1xf32, #tpu.memory_space<vmem>>, vector<2x1xf32>,
    return
  }
}

</mosaic_0001>

<bundles_post_ra>
// kernel: my_model_forward.1
= control target key start
LH: loop header
LB: loop body
LE: loop exit
PB: predicated region body
PF: predicated region fallthrough
CT: control target
= control target key end

     0   :  { %vm35_vm0 = vcmask 261120   ;;  %v141_v56 = vlaneseq  ;;  %s4383_s6 = smov 96   ;;  %s4384_s11 = smov 112   ;;  %vm4386_vm1 = vmmov 0   ;;  %vm341_vm2 = vcmask 130048   ;;  %s5352_s0 = inlined_call_operand.vmem [shape: f32[64,32], index: 0, kind: input, shape index: {}]   ;;  %s5353_s3 = inlined_call_operand.vmem [shape: f32[8,128], index: 3, kind: input, shape index: {}]   ;;  %s5354_s2 = inlined_call_operand.vmem [shape: bf16[64,256], index: 2, kind: input, shape index: {}]   ;;  %s5355_s1 = inlined_call_operand.vmem [shape: f32[8,8], index: 1, kind: input, shape index: {}]   ;;  %s5356_s4 = inlined_call_operand.vmem [shape: f32[2,1], index: 4, kind: output, shape index: {}]  }
   0x1   :  { %v27_v0 = vld [vmem:[%s5352_s0] sm:$0xff]  ;;  %v29_v1 = vld [vmem:[%s5352_s0 + $0x10] sm:$0xff]  ;;  %v28_v2 = vld [vmem:[%s5352_s0 + $0x8] sm:$0xff]  ;;  %s4387_s12 = smov 64   ;;  %vm1628_vm3 = vcmask 64512   ;;  %s4389_s20 = smov 32  }
   0x2   :  { %v36_v3 = vsel %vm35_vm0, %v27_v0, 0.0  ;;  %v42_v4 = vsel %vm35_vm0, %v29_v1, 0.0  ;;  %v30_v5 = vld [vmem:[%s5352_s0 + $0x18] sm:$0xff]  ;;  %v39_v6 = vsel %vm35_vm0, %v28_v2, 0.0  ;;  %v31_v8 = vld [vmem:[%s5352_s0 + $0x20] sm:$0xff]  ;;  %v32_v9 = vld [vmem:[%s5352_s0 + $0x28] sm:$0xff] }
   0x3   :  { %37 = vadd.xlane.f32.xlu0 %v36_v3  ;;  %43 = vadd.xlane.f32.xlu1 %v42_v4  ;;  %v45_v7 = vsel %vm35_vm0, %v30_v5, 0.0  ;;  %v48_v10 = vsel %vm35_vm0, %v31_v8, 0.0  ;;  %v51_v11 = vsel %vm35_vm0, %v32_v9, 0.0  ;;  %v33_v12 = vld [vmem:[%s5352_s0 + $0x30] sm:$0xff]  ;;  %v34_v13 = vld [vmem:[%s5352_s0 + $0x38] sm:$0xff]  ;;  %v4488_v57 = vshrl.u32 %v141_v56, 7 }
   0x4   :  { %v54_v14 = vsel %vm35_vm0, %v33_v12, 0.0  ;;  %v57_v15 = vsel %vm35_vm0, %v34_v13, 0.0  ;;  %v4494_v59 = vld [vmem:[%s5353_s3] sm:$0xff]  ;;  %v4245_v62 = vld [vmem:[%s5354_s2 + $0x10] ss:$8 sps:$4 sm:$0xff]   ;;  %s4390_s23 = smov 16  }
   0x5   :  { %v143_v58 = vsub.s32 1, %v4488_v57  ;;  %v4242_v61 = vld [vmem:[%s5354_s2] ss:$8 sps:$4 sm:$0xff]   ;;  %vm3485_vm4 = vcmask 523264   ;;  %vm3719_vm5 = vcmask 1041409   ;;  %vm3722_vm6 = vcmask 1042434  }
   0x6   :  { %3994 = vmatprep.subr.bf16.mxu0 %v4242_v61  ;;  %vm3725_vm7 = vcmask 1043459   ;;  %vm3728_vm8 = vcmask 1044484   ;;  %vm3731_vm9 = vcmask 1045509   ;;  %vm3734_vm10 = vcmask 1046534  }
   0x7   :  { %40 = vadd.xlane.f32.xlu0 %v39_v6  ;;  %46 = vadd.xlane.f32.xlu1 %v45_v7  ;;  %v4497_v60 = vrot.slane %v4494_v59, %v143_v58  ;;  %vm3737_vm11 = vcmask 1047559   ;;  %vm3808_vm12 = vcmask 785408   ;;  %vm3815_vm13 = vcmask 1041408  }
   0x8   :  { %3995 = vmatpush3.bf16.msra.mxu0 %v4242_v61  ;;  %vm3824_vm14 = vcmask 1024  }
   0x9   :  { %3996 = vmatprep.subr.bf16.mxu0 %v4245_v62 }
   0xb   :  { %49 = vadd.xlane.f32.xlu0 %v48_v10  ;;  %52 = vadd.xlane.f32.xlu1 %v51_v11 }
   0xc   :  { %3997 = vmatpush3.bf16.msra.mxu0 %v4245_v62 }
   0xf   :  { %55 = vadd.xlane.f32.xlu0 %v54_v14  ;;  %58 = vadd.xlane.f32.xlu1 %v57_v15 }
  0x90   :  { %v38_v16 = vpop.xlane.xlu0 %37  ;;  %v44_v17 = vpop.xlane.xlu1 %43 }
  0x91   :  { %v61_v18 = vmul.f32 0.03125, %v38_v16  ;;  %v63_v19 = vmul.f32 0.03125, %v44_v17 }
  0x93   :  { %v4448_v20 = vsub.f32 %v27_v0, %v61_v18  ;;  %v4450_v21 = vsub.f32 %v29_v1, %v63_v19 }
  0x94   :  { %v41_v22 = vpop.xlane.xlu0 %40  ;;  %v47_v23 = vpop.xlane.xlu1 %46 }
  0x95   :  { %v62_v24 = vmul.f32 0.03125, %v41_v22  ;;  %v64_v25 = vmul.f32 0.03125, %v47_v23  ;;  %v77_v26 = vmul.f32 %v4448_v20, %v4448_v20  ;;  %v79_v27 = vmul.f32 %v4450_v21, %v4450_v21 }
  0x97   :  { %v4456_v28 = vsub.f32 %v28_v2, %v62_v24  ;;  %v4458_v29 = vsub.f32 %v30_v5, %v64_v25  ;;  %v85_v30 = vsel %vm35_vm0, %v77_v26, 0.0  ;;  %v91_v33 = vsel %vm35_vm0, %v79_v27, 0.0 }
  0x98   :  { %86 = vadd.xlane.f32.xlu0 %v85_v30  ;;  %v50_v31 = vpop.xlane.xlu0 %49  ;;  %v53_v32 = vpop.xlane.xlu1 %52 }
  0x99   :  { %v65_v34 = vmul.f32 0.03125, %v50_v31  ;;  %v66_v35 = vmul.f32 0.03125, %v53_v32  ;;  %v78_v36 = vmul.f32 %v4456_v28, %v4456_v28  ;;  %v80_v37 = vmul.f32 %v4458_v29, %v4458_v29 }
  0x9b   :  { %v4466_v38 = vsub.f32 %v31_v8, %v65_v34  ;;  %v4468_v39 = vsub.f32 %v32_v9, %v66_v35  ;;  %v88_v40 = vsel %vm35_vm0, %v78_v36, 0.0  ;;  %v94_v43 = vsel %vm35_vm0, %v80_v37, 0.0 }
  0x9c   :  { %92 = vadd.xlane.f32.xlu0 %v91_v33  ;;  %89 = vadd.xlane.f32.xlu1 %v88_v40  ;;  %v56_v41 = vpop.xlane.xlu0 %55  ;;  %v59_v42 = vpop.xlane.xlu1 %58 }
  0x9d   :  { %v67_v44 = vmul.f32 0.03125, %v56_v41  ;;  %v68_v45 = vmul.f32 0.03125, %v59_v42  ;;  %v81_v46 = vmul.f32 %v4466_v38, %v4466_v38  ;;  %v82_v47 = vmul.f32 %v4468_v39, %v4468_v39 }
  0x9f   :  { %v4476_v48 = vsub.f32 %v33_v12, %v67_v44  ;;  %v4478_v49 = vsub.f32 %v34_v13, %v68_v45  ;;  %v97_v50 = vsel %vm35_vm0, %v81_v46, 0.0  ;;  %v100_v51 = vsel %vm35_vm0, %v82_v47, 0.0 }
  0xa0   :  { %95 = vadd.xlane.f32.xlu1 %v94_v43  ;;  %98 = vadd.xlane.f32.xlu0 %v97_v50 }
  0xa1   :  { %v83_v52 = vmul.f32 %v4476_v48, %v4476_v48  ;;  %v84_v53 = vmul.f32 %v4478_v49, %v4478_v49 }
  0xa3   :  { %v103_v54 = vsel %vm35_vm0, %v83_v52, 0.0  ;;  %v106_v55 = vsel %vm35_vm0, %v84_v53, 0.0 }
  0xa4   :  { %101 = vadd.xlane.f32.xlu1 %v100_v51  ;;  %104 = vadd.xlane.f32.xlu0 %v103_v54 }
  0xa8   :  { %107 = vadd.xlane.f32.xlu1 %v106_v55 }
  0xba   :  { %154 = vrot.lane.b32.xlu0 %v4497_v60, %s4383_s6 }
 0x125   :  { %v87_v63 = vpop.xlane.xlu0 %86 }
 0x126   :  { %v109_v0 = vmul.f32 0.03125, %v87_v63 }
 0x128   :  { %v117_v1 = vadd.f32 1e-12, %v109_v0 }
 0x129   :  { %v90_v2 = vpop.xlane.xlu1 %89  ;;  %v93_v3 = vpop.xlane.xlu0 %92 }
 0x12a   :  { %4250 = vrsqrt.f32 %v117_v1  ;;  %v110_v4 = vmul.f32 0.03125, %v90_v2  ;;  %v111_v5 = vmul.f32 0.03125, %v93_v3 }
 0x12c   :  { %v118_v6 = vadd.f32 1e-12, %v110_v4  ;;  %v119_v7 = vadd.f32 1e-12, %v111_v5 }
 0x12d   :  { %v96_v8 = vpop.xlane.xlu1 %95  ;;  %v99_v9 = vpop.xlane.xlu0 %98 }
 0x12e   :  { %4252 = vrsqrt.f32 %v118_v6  ;;  %v112_v10 = vmul.f32 0.03125, %v96_v8  ;;  %v113_v11 = vmul.f32 0.03125, %v99_v9  ;;  %v4385_v9 = vmov 0.0  }
 0x12f   :  { %4254 = vrsqrt.f32 %v119_v7  ;;  %4006 = vmatprep.subr.mxu1 %v4385_v9  ;;  %4031 = vmatprep.subr.mxu0 %v4385_v9 }
 0x130   :  { %v120_v12 = vadd.f32 1e-12, %v112_v10  ;;  %v121_v13 = vadd.f32 1e-12, %v113_v11  ;;  %4008 = vmatprep.mubr.msk.f32.mxu1 %vm4386_vm1, %v4385_v9 }
 0x131   :  { %v102_v14 = vpop.xlane.xlu1 %101  ;;  %v105_v15 = vpop.xlane.xlu0 %104 }
 0x132   :  { %4256 = vrsqrt.f32 %v120_v12  ;;  %v114_v16 = vmul.f32 0.03125, %v102_v14  ;;  %v115_v17 = vmul.f32 0.03125, %v105_v15 }
 0x133   :  { %4258 = vrsqrt.f32 %v121_v13 }
 0x134   :  { %v4251_v18 = vpop.eup %4250  ;;  %v122_v19 = vadd.f32 1e-12, %v114_v16  ;;  %v123_v22 = vadd.f32 1e-12, %v115_v17 }
 0x135   :  { %v108_v23 = vpop.xlane.xlu1 %107  ;;  %v133_v24 = vmul.f32 %v4251_v18, %v4448_v20  ;;  %v155_v33 = vpop.permute.xlu0 %154 }
 0x136   :  { %4260 = vrsqrt.f32 %v122_v19  ;;  %v116_v25 = vmul.f32 0.03125, %v108_v23 }
 0x137   :  { %4262 = vrsqrt.f32 %v123_v22  ;;  %v145_v32 = vmul.f32 %v4497_v60, %v133_v24 }
 0x138   :  { %v4253_v26 = vpop.eup %4252  ;;  %v124_v27 = vadd.f32 1e-12, %v116_v25 }
 0x139   :  { %v4255_v30 = vpop.eup %4254  ;;  %v134_v31 = vmul.f32 %v4253_v26, %v4456_v28  ;;  %v4512_v40 = vadd.f32 %v155_v33, %v145_v32 }
 0x13a   :  { %4264 = vrsqrt.f32 %v124_v27  ;;  %v135_v34 = vmul.f32 %v4255_v30, %v4450_v21 }
 0x13b   :  { %v146_v35 = vmul.f32 %v4497_v60, %v134_v31 }
 0x13c   :  { %v4257_v36 = vpop.eup %4256  ;;  %v147_v42 = vmul.f32 %v4497_v60, %v135_v34 }
 0x13d   :  { %v4259_v37 = vpop.eup %4258  ;;  %v4514_v20 = vadd.f32 %v155_v33, %v146_v35  ;;  %v136_v41 = vmul.f32 %v4257_v36, %v4458_v29 }
 0x13e   :  { %v137_v28 = vmul.f32 %v4259_v37, %v4466_v38  ;;  %v4523_v46 = vadd.f32 %v155_v33, %v147_v42 }
 0x13f   :  { %v165_v43 = vpack.c.bf16 %v4514_v20, %v4512_v40  ;;  %v148_v44 = vmul.f32 %v4497_v60, %v136_v41 }
 0x140   :  { %v4261_v21 = vpop.eup %4260  ;;  %v149_v29 = vmul.f32 %v4497_v60, %v137_v28 }
 0x141   :  { %v4263_v45 = vpop.eup %4262  ;;  %3998 = vmatprep.mubr.msk.bf16.mxu0 %vm35_vm0, %v165_v43  ;;  %v4525_v47 = vadd.f32 %v155_v33, %v148_v44  ;;  %v138_v50 = vmul.f32 %v4261_v21, %v4468_v39 }
 0x142   :  { %v139_v51 = vmul.f32 %v4263_v45, %v4476_v48  ;;  %v4534_v54 = vadd.f32 %v155_v33, %v149_v29 }
 0x143   :  { %v166_v38 = vpack.c.bf16 %v4525_v47, %v4523_v46  ;;  %v150_v52 = vmul.f32 %v4497_v60, %v138_v50 }
 0x144   :  { %v4265_v53 = vpop.eup %4264  ;;  %v151_v39 = vmul.f32 %v4497_v60, %v139_v51  ;;  %v4388_v51 = vmov 1966171168  }
 0x145   :  { %3999 = vmatmul.mubr.msk.bf16.vlgmr.msra.gmra.mrb[0].mxu0 %vm35_vm0, %v166_v38  ;;  %v4536_v55 = vadd.f32 %v155_v33, %v150_v52  ;;  %v140_v56 = vmul.f32 %v4265_v53, %v4478_v49  ;;  %v4552_v49 = vsub.s32 0, %v4488_v57  ;;  %v292_v38 = vunpack.c.l.s4 %v4388_v51  ;;  %v286_v52 = vld [vmem:[%s5355_s1] sm:$0xff] }
 0x146   :  { %v4544_v61 = vadd.f32 %v155_v33, %v151_v39  ;;  %v287_v53 = vsub.f32 1.0, %v286_v52 }
 0x147   :  { %v167_v58 = vpack.c.bf16 %v4536_v55, %v4534_v54  ;;  %v152_v48 = vmul.f32 %v4497_v60, %v140_v56  ;;  %v4556_v0 = vrot.slane %v4494_v59, %v4552_v49  ;;  %v293_v56 = vunpack.c.0.s8 %v292_v38 }
 0x148   :  { %v288_v39 = vmul.f32 -1e+09, %v287_v53 }
 0x149   :  { %4002 = vmatprep.mubr.msk.bf16.mxu0 %vm35_vm0, %v167_v58  ;;  %v4546_v62 = vadd.f32 %v155_v33, %v152_v48  ;;  %v296_v58 = vsub.s32 %v293_v56, %v4488_v57 }
 0x14b   :  { %v168_v63 = vpack.c.bf16 %v4546_v62, %v4544_v61  ;;  %v297_v48 = vrot.slane %v288_v39, %v296_v58 }
 0x14d   :  { %4003 = vmatmul.mubr.msk.bf16.gmra.mrb[4].mxu0 %vm35_vm0, %v168_v63  ;;  %v290_v63 = vcombine.high %v288_v39, %v288_v39 }
 0x14e   :  { %4033 = vmatprep.mubr.msk.f32.mxu0 %vm4386_vm1, %v4385_v9 }
 0x218   :  { %v4000_v1 = vpop.f32.mrb[0].mxu0 }
 0x219   :  { %v231_v2 = vpop.f32.mrb[1].mxu0  ;;  %v4570_v10 = vadd.f32 %v4000_v1, %v4556_v0  ;;  %v313_v1 = vrot.slane %v297_v48, %v296_v58 }
 0x21a   :  { %v232_v3 = vadd.f32 %v231_v2, %v4556_v0  ;;  %v4001_v4 = vpop.f32.mrb[2].mxu0  ;;  %v305_v2 = vcombine.high %v297_v48, %v297_v48 }
 0x21b   :  { %v4560_v5 = vadd.f32 %v4001_v4, %v4556_v0  ;;  %v234_v6 = vpop.f32.mrb[3].mxu0  ;;  %v4753_v4 = vrot.slane %v313_v1, %v4552_v49 }
 0x21c   :  { %270 = vrot.lane.b32.xlu1 %v232_v3, %s4384_s11  ;;  %v4564_v7 = vadd.f32 %v234_v6, %v4556_v0 }
 0x21d   :  { %276 = vrot.lane.b32.xlu0 %v4560_v5, %s4384_s11 }
 0x220   :  { %v4004_v8 = vpop.f32.mrb[4].mxu0  ;;  %272 = vrot.lane.b32.xlu1 %v4564_v7, %s4384_s11 }
 0x221   :  { %v247_v59 = vpop.f32.mrb[5].mxu0  ;;  %v4587_v16 = vadd.f32 %v4004_v8, %v4556_v0 }
 0x222   :  { %v4005_v11 = vpop.f32.mrb[6].mxu0  ;;  %v4581_v14 = vadd.f32 %v247_v59, %v4556_v0 }
 0x223   :  { %v250_v12 = vpop.f32.mrb[7].mxu0  ;;  %v259_v15 = vadd.f32 %v4005_v11, %v4556_v0 }
 0x224   :  { %v4573_v13 = vadd.f32 %v250_v12, %v4556_v0  ;;  %274 = vrot.lane.b32.xlu1 %v4570_v10, %s4384_s11  ;;  %v335_v12 = vcombine.high %v313_v1, %v313_v1 }
 0x226   :  { %280 = vrot.lane.b32.xlu0 %v4573_v13, %s4384_s11 }
 0x228   :  { %278 = vrot.lane.b32.xlu1 %v4581_v14, %s4384_s11 }
 0x22a   :  { %284 = vrot.lane.b32.xlu0 %v259_v15, %s4384_s11 }
 0x22c   :  { %282 = vrot.lane.b32.xlu1 %v4587_v16, %s4384_s11 }
 0x22e   :  { %416 = vrot.lane.b32.xlu0 %v4564_v7, %s4383_s6 }
 0x230   :  { %339 = vrot.lane.b32.xlu1 %v232_v3, %s4383_s6 }
 0x232   :  { %568 = vrot.lane.b32.xlu0 %v4560_v5, %s4383_s6 }
 0x234   :  { %492 = vrot.lane.b32.xlu1 %v4570_v10, %s4383_s6 }
 0x236   :  { %720 = vrot.lane.b32.xlu0 %v4573_v13, %s4383_s6 }
 0x238   :  { %644 = vrot.lane.b32.xlu1 %v4581_v14, %s4383_s6 }
 0x23a   :  { %872 = vrot.lane.b32.xlu0 %v259_v15, %s4383_s6 }
 0x23c   :  { %796 = vrot.lane.b32.xlu1 %v4587_v16, %s4383_s6 }
 0x28e   :  { %v4604_v17 = vpop.permute.xlu1 %270 }
 0x28f   :  { %948 = vrot.lane.b32.xlu1 %v4604_v17, %s4383_s6  ;;  %v4612_v19 = vpop.permute.xlu0 %276 }
 0x292   :  { %v4608_v18 = vpop.permute.xlu1 %272 }
 0x293   :  { %1024 = vrot.lane.b32.xlu0 %v4608_v18, %s4383_s6 }
 0x296   :  { %v4614_v22 = vpop.permute.xlu1 %274 }
 0x297   :  { %1176 = vrot.lane.b32.xlu0 %v4612_v19, %s4383_s6  ;;  %1100 = vrot.lane.b32.xlu1 %v4614_v22, %s4383_s6 }
 0x298   :  { %v4620_v23 = vpop.permute.xlu0 %280 }
 0x29a   :  { %v4622_v24 = vpop.permute.xlu1 %278 }
 0x29b   :  { %1328 = vrot.lane.b32.xlu0 %v4620_v23, %s4383_s6  ;;  %1252 = vrot.lane.b32.xlu1 %v4622_v24, %s4383_s6 }
 0x29c   :  { %v4628_v25 = vpop.permute.xlu0 %284 }
 0x29e   :  { %v4630_v26 = vpop.permute.xlu1 %282 }
 0x29f   :  { %1480 = vrot.lane.b32.xlu0 %v4628_v25, %s4383_s6  ;;  %1404 = vrot.lane.b32.xlu1 %v4630_v26, %s4383_s6 }
 0x2a0   :  { %v417_v27 = vpop.permute.xlu0 %416 }
 0x2a2   :  { %v340_v30 = vpop.permute.xlu1 %339 }
 0x2a3   :  { %1881 = vrot.lane.b32.xlu0 %v4564_v7, %s4387_s12  ;;  %1805 = vrot.lane.b32.xlu1 %v232_v3, %s4387_s12 }
 0x2a4   :  { %4007 = vmatpush3.xpose.msk.msra.mxu1 %vm341_vm2, %v340_v30  ;;  %v569_v31 = vpop.permute.xlu0 %568 }
 0x2a5   :  { %4011 = vmatprep.subr.mxu1 %v4385_v9 }
 0x2a6   :  { %v493_v33 = vpop.permute.xlu1 %492 }
 0x2a7   :  { %4009 = vmatmul.mubr.msk.f32.vlgmr.msra.gmra.mrb[0].mxu1 %vm341_vm2, %v232_v3  ;;  %2033 = vrot.lane.b32.xlu0 %v4560_v5, %s4387_s12  ;;  %v304_v3 = vrot.slane %v290_v63, %v296_v58 }
 0x2a8   :  { %1957 = vrot.lane.b32.xlu1 %v4570_v10, %s4387_s12  ;;  %4012 = vmatpush3.xpose.msk.msra.mxu1 %vm341_vm2, %v417_v27  ;;  %v721_v32 = vpop.permute.xlu0 %720 }
 0x2a9   :  { %4013 = vmatprep.mubr.msk.f32.mxu1 %vm4386_vm1, %v4385_v9  ;;  %4032 = vmatpush3.xpose.msk.msra.mxu0 %vm341_vm2, %v721_v32  ;;  %v4767_v32 = vrot.slane %v335_v12, %v4552_v49 }
 0x2aa   :  { %4016 = vmatprep.subr.mxu1 %v4385_v9  ;;  %4041 = vmatprep.subr.mxu0 %v4385_v9  ;;  %v645_v35 = vpop.permute.xlu1 %644 }
 0x2ab   :  { %4014 = vmatmul.mubr.msk.f32.vlgmr.msra.gmra.mrb[2].mxu1 %vm341_vm2, %v4564_v7  ;;  %2337 = vrot.lane.b32.xlu0 %v259_v15, %s4387_s12  ;;  %v306_v7 = vcombine.high %v304_v3, %v304_v3 }
 0x2ac   :  { %2109 = vrot.lane.b32.xlu1 %v4581_v14, %s4387_s12  ;;  %4017 = vmatpush3.xpose.msk.msra.mxu1 %vm341_vm2, %v493_v33  ;;  %v873_v34 = vpop.permute.xlu0 %872 }
 0x2ad   :  { %4034 = vmatmul.mubr.msk.f32.vlgmr.msra.gmra.mrb[8].mxu0 %vm341_vm2, %v4573_v13  ;;  %4018 = vmatprep.mubr.msk.f32.mxu1 %vm4386_vm1, %v4385_v9 }
 0x2ae   :  { %4042 = vmatpush3.xpose.msk.msra.mxu0 %vm341_vm2, %v873_v34  ;;  %4021 = vmatprep.subr.mxu1 %v4385_v9  ;;  %v797_v36 = vpop.permute.xlu1 %796 }
 0x2af   :  { %4019 = vmatmul.mubr.msk.f32.vlgmr.msra.gmra.mrb[4].mxu1 %vm341_vm2, %v4570_v10  ;;  %4043 = vmatprep.mubr.msk.f32.mxu0 %vm4386_vm1, %v4385_v9 }
 0x2b0   :  { %2185 = vrot.lane.b32.xlu1 %v4573_v13, %s4387_s12  ;;  %4022 = vmatpush3.xpose.msk.msra.mxu1 %vm341_vm2, %v569_v31 }
 0x2b1   :  { %4044 = vmatmul.mubr.msk.f32.vlgmr.msra.gmra.mrb[10].mxu0 %vm341_vm2, %v259_v15  ;;  %4023 = vmatprep.mubr.msk.f32.mxu1 %vm4386_vm1, %v4385_v9 }
 0x2b2   :  { %4026 = vmatprep.subr.mxu1 %v4385_v9  ;;  %4051 = vmatprep.subr.mxu0 %v4385_v9 }
 0x2b3   :  { %4024 = vmatmul.mubr.msk.f32.vlgmr.msra.gmra.mrb[6].mxu1 %vm341_vm2, %v4560_v5  ;;  %4053 = vmatprep.mubr.msk.f32.mxu0 %vm4386_vm1, %v4385_v9  ;;  %v327_v5 = vrot.slane %v305_v2, %v296_v58  ;;  %v320_v2 = vrot.slane %v304_v3, %v296_v58 }
 0x2b4   :  { %2261 = vrot.lane.b32.xlu1 %v4587_v16, %s4387_s12  ;;  %4027 = vmatpush3.xpose.msk.msra.mxu1 %vm341_vm2, %v645_v35 }
 0x2b5   :  { %4028 = vmatprep.mubr.msk.f32.mxu1 %vm4386_vm1, %v4385_v9  ;;  %4036 = vmatprep.subr.mxu1 %v4385_v9  ;;  %v4759_v11 = vrot.slane %v327_v5, %v4552_v49 }
 0x2b7   :  { %4029 = vmatmul.mubr.msk.f32.vlgmr.msra.gmra.mrb[8].mxu1 %vm341_vm2, %v4581_v14  ;;  %v334_v14 = vrot.slane %v306_v7, %v296_v58  ;;  %v336_v7 = vcombine.high %v320_v2, %v320_v2 }
 0x2b8   :  { %2413 = vrot.lane.b32.xlu1 %v4604_v17, %s4387_s12  ;;  %4037 = vmatpush3.xpose.msk.msra.mxu1 %vm341_vm2, %v797_v36 }
 0x2b9   :  { %4038 = vmatprep.mubr.msk.f32.mxu1 %vm4386_vm1, %v4385_v9  ;;  %4046 = vmatprep.subr.mxu1 %v4385_v9  ;;  %v4770_v34 = vrot.slane %v334_v14, %v4552_v49  ;;  %v1599_v12 = vrot.slane %v336_v7, %v4552_v49 }
 0x2bb   :  { %4039 = vmatmul.mubr.msk.f32.vlgmr.msra.gmra.mrb[10].mxu1 %vm341_vm2, %v4587_v16 }
 0x2bc   :  { %4048 = vmatprep.mubr.msk.f32.mxu1 %vm4386_vm1, %v4385_v9 }
 0x301   :  { %v949_v37 = vpop.permute.xlu1 %948 }
 0x302   :  { %4047 = vmatpush3.xpose.msk.msra.mxu1 %vm341_vm2, %v949_v37 }
 0x303   :  { %4056 = vmatprep.subr.mxu1 %v4385_v9 }
 0x305   :  { %v1025_v41 = vpop.permute.xlu0 %1024  ;;  %4049 = vmatmul.mubr.msk.f32.vlgmr.msra.gmra.mrb[12].mxu1 %vm341_vm2, %v4604_v17 }
 0x306   :  { %4052 = vmatpush3.xpose.msk.msra.mxu0 %vm341_vm2, %v1025_v41  ;;  %4058 = vmatprep.mubr.msk.f32.mxu1 %vm4386_vm1, %v4385_v9 }
 0x307   :  { %4061 = vmatprep.subr.mxu0 %v4385_v9 }
 0x309   :  { %4054 = vmatmul.mubr.msk.f32.vlgmr.msra.gmra.mrb[12].mxu0 %vm341_vm2, %v4608_v18  ;;  %v1177_v42 = vpop.permute.xlu0 %1176  ;;  %v1101_v28 = vpop.permute.xlu1 %1100 }
 0x30a   :  { %4057 = vmatpush3.xpose.msk.msra.mxu1 %vm341_vm2, %v1101_v28  ;;  %4062 = vmatpush3.xpose.msk.msra.mxu0 %vm341_vm2, %v1177_v42  ;;  %v337_v42 = vcombine.high %v327_v5, %v327_v5 }
 0x30b   :  { %4063 = vmatprep.mubr.msk.f32.mxu0 %vm4386_vm1, %v4385_v9  ;;  %4071 = vmatprep.subr.mxu0 %v4385_v9 }
 0x30c   :  { %4066 = vmatprep.subr.mxu1 %v4385_v9  ;;  %v1587_v38 = vrot.slane %v337_v42, %v4552_v49 }
 0x30d   :  { %4064 = vmatmul.mubr.msk.f32.vlgmr.msra.gmra.mrb[14].mxu0 %vm341_vm2, %v4612_v19  ;;  %v1329_v43 = vpop.permute.xlu0 %1328  ;;  %4059 = vmatmul.mubr.msk.f32.vlgmr.msra.gmra.mrb[14].mxu1 %vm341_vm2, %v4614_v22  ;;  %v1253_v44 = vpop.permute.xlu1 %1252 }
 0x30e   :  { %4067 = vmatpush3.xpose.msk.msra.mxu1 %vm341_vm2, %v1253_v44  ;;  %4072 = vmatpush3.xpose.msk.msra.mxu0 %vm341_vm2, %v1329_v43 }
 0x30f   :  { %4068 = vmatprep.mubr.msk.f32.mxu1 %vm4386_vm1, %v4385_v9  ;;  %4073 = vmatprep.mubr.msk.f32.mxu0 %vm4386_vm1, %v4385_v9 }
 0x310   :  { %4081 = vmatprep.subr.mxu0 %v4385_v9  ;;  %4076 = vmatprep.subr.mxu1 %v4385_v9 }
 0x311   :  { %4074 = vmatmul.mubr.msk.f32.vlgmr.msra.gmra.mrb[16].mxu0 %vm341_vm2, %v4620_v23  ;;  %v1481_v21 = vpop.permute.xlu0 %1480  ;;  %4069 = vmatmul.mubr.msk.f32.vlgmr.msra.gmra.mrb[16].mxu1 %vm341_vm2, %v4622_v24  ;;  %v1405_v45 = vpop.permute.xlu1 %1404 }
 0x312   :  { %4077 = vmatpush3.xpose.msk.msra.mxu1 %vm341_vm2, %v1405_v45  ;;  %4082 = vmatpush3.xpose.msk.msra.mxu0 %vm341_vm2, %v1481_v21 }
 0x313   :  { %4078 = vmatprep.mubr.msk.f32.mxu1 %vm4386_vm1, %v4385_v9  ;;  %4083 = vmatprep.mubr.msk.f32.mxu0 %vm4386_vm1, %v4385_v9 }
 0x314   :  { %4091 = vmatprep.subr.mxu0 %v4385_v9  ;;  %4086 = vmatprep.subr.mxu1 %v4385_v9 }
 0x315   :  { %4084 = vmatmul.mubr.msk.f32.vlgmr.msra.gmra.mrb[18].mxu0 %vm341_vm2, %v4628_v25  ;;  %v1882_v50 = vpop.permute.xlu0 %1881  ;;  %4079 = vmatmul.mubr.msk.f32.vlgmr.msra.gmra.mrb[18].mxu1 %vm341_vm2, %v4630_v26  ;;  %v1806_v29 = vpop.permute.xlu1 %1805 }
 0x316   :  { %4087 = vmatpush3.msra.mxu1 %v1806_v29  ;;  %4092 = vmatpush3.msra.mxu0 %v1882_v50 }
 0x317   :  { %4088 = vmatprep.mubr.msk.f32.mxu1 %vm4386_vm1, %v4385_v9  ;;  %4096 = vmatprep.subr.mxu1 %v4385_v9 }
 0x318   :  { %4093 = vmatprep.mubr.msk.f32.mxu0 %vm4386_vm1, %v4385_v9  ;;  %4101 = vmatprep.subr.mxu0 %v4385_v9 }
 0x37a   :  { %v412_v6 = vpop.f32.mrb[0].mxu1 }
 0x37b   :  { %v1556_v8 = vmul.f32 0.25, %v412_v6  ;;  %v4010_v59 = vpop.f32.mrb[1].mxu1  ;;  %v1591_v6 = vrot.slane %v320_v2, %v4552_v49 }
 0x37d   :  { %v4756_v10 = vadd.f32 %v4753_v4, %v1556_v8 }
 0x37e   :  { %v488_v13 = vpop.f32.mrb[2].mxu1 }
 0x37f   :  { %v1557_v15 = vmul.f32 0.25, %v488_v13  ;;  %v4015_v16 = vpop.f32.mrb[3].mxu1  ;;  %v1629_v17 = vsel %vm1628_vm3, %v4756_v10, -inf }
 0x380   :  { %v792_v27 = vpop.f32.mrb[8].mxu0  ;;  %1630 = vmax.xlane.f32.xlu1 %v1629_v17 }
 0x381   :  { %v4035_v30 = vpop.f32.mrb[9].mxu0  ;;  %v4764_v31 = vadd.f32 %v4759_v11, %v1557_v15  ;;  %v1561_v35 = vmul.f32 0.25, %v792_v27 }
 0x382   :  { %v564_v33 = vpop.f32.mrb[4].mxu1 }
 0x383   :  { %v1558_v36 = vmul.f32 0.25, %v564_v33  ;;  %v4020_v37 = vpop.f32.mrb[5].mxu1  ;;  %v1632_v41 = vsel %vm1628_vm3, %v4764_v31, -inf  ;;  %v4780_v51 = vadd.f32 %v4770_v34, %v1561_v35 }
 0x384   :  { %v944_v28 = vpop.f32.mrb[10].mxu0  ;;  %1633 = vmax.xlane.f32.xlu0 %v1632_v41 }
 0x385   :  { %v4045_v43 = vpop.f32.mrb[11].mxu0  ;;  %v4775_v44 = vadd.f32 %v4767_v32, %v1558_v36  ;;  %v1644_v56 = vsel %vm1628_vm3, %v4780_v51, -inf  ;;  %v1563_v58 = vmul.f32 0.25, %v944_v28 }
 0x386   :  { %v640_v21 = vpop.f32.mrb[6].mxu1 }
 0x387   :  { %v1559_v45 = vmul.f32 0.25, %v640_v21  ;;  %v4025_v50 = vpop.f32.mrb[7].mxu1  ;;  %v1635_v29 = vsel %vm1628_vm3, %v4775_v44, -inf }
 0x388   :  { %1636 = vmax.xlane.f32.xlu0 %v1635_v29 }
 0x389   :  { %v4785_v39 = vadd.f32 %v1587_v38, %v1559_v45 }
 0x38a   :  { %v716_v52 = vpop.f32.mrb[8].mxu1 }
 0x38b   :  { %v4030_v53 = vpop.f32.mrb[9].mxu1  ;;  %v1638_v1 = vsel %vm1628_vm3, %v4785_v39, -inf  ;;  %v1560_v5 = vmul.f32 0.25, %v716_v52 }
 0x38c   :  { %1645 = vmax.xlane.f32.xlu0 %v1644_v56 }
 0x38d   :  { %v4794_v59 = vadd.f32 %v1591_v6, %v1560_v5 }
 0x38e   :  { %v868_v48 = vpop.f32.mrb[10].mxu1 }
 0x38f   :  { %v4040_v63 = vpop.f32.mrb[11].mxu1  ;;  %v1562_v8 = vmul.f32 0.25, %v868_v48  ;;  %v1641_v13 = vsel %vm1628_vm3, %v4794_v59, -inf }
 0x390   :  { %1639 = vmax.xlane.f32.xlu0 %v1638_v1 }
 0x391   :  { %2565 = vrot.lane.b32.xlu1 %v4614_v22, %s4387_s12  ;;  %v4799_v15 = vadd.f32 %v1599_v12, %v1562_v8 }
 0x393   :  { %v1647_v22 = vsel %vm1628_vm3, %v4799_v15, -inf }
 0x3a6   :  { %2489 = vrot.lane.b32.xlu0 %v4608_v18, %s4387_s12  ;;  %v338_v18 = vcombine.high %v334_v14, %v334_v14 }
 0x3a8   :  { %v1603_v3 = vrot.slane %v338_v18, %v4552_v49 }
 0x3aa   :  { %v4804_v16 = vadd.f32 %v1603_v3, %v1563_v58 }
 0x3ac   :  { %v1650_v17 = vsel %vm1628_vm3, %v4804_v16, -inf }
 0x3b5   :  { %1642 = vmax.xlane.f32.xlu1 %v1641_v13 }
 0x3b9   :  { %1648 = vmax.xlane.f32.xlu1 %v1647_v22 }
 0x3c5   :  { %1651 = vmax.xlane.f32.xlu0 %v1650_v17 }
 0x3d8   :  { %v1020_v27 = vpop.f32.mrb[12].mxu1 }
 0x3d9   :  { %v1564_v30 = vmul.f32 0.25, %v1020_v27  ;;  %v4050_v33 = vpop.f32.mrb[13].mxu1 }
 0x3db   :  { %v4809_v35 = vadd.f32 %v4753_v4, %v1564_v30 }
 0x3dc   :  { %v1096_v36 = vpop.f32.mrb[12].mxu0 }
 0x3dd   :  { %v1565_v37 = vmul.f32 0.25, %v1096_v36  ;;  %v4055_v41 = vpop.f32.mrb[13].mxu0  ;;  %v1653_v14 = vsel %vm1628_vm3, %v4809_v35, -inf  ;;  %v4844_v36 = vpop.permute.xlu1 %1957 }
 0x3de   :  { %1654 = vmax.xlane.f32.xlu1 %v1653_v14 }
 0x3df   :  { %v4814_v49 = vadd.f32 %v4759_v11, %v1565_v37 }
 0x3e0   :  { %v1172_v42 = vpop.f32.mrb[14].mxu1  ;;  %v1248_v28 = vpop.f32.mrb[14].mxu0 }
 0x3e1   :  { %v1566_v43 = vmul.f32 0.25, %v1172_v42  ;;  %v1567_v21 = vmul.f32 0.25, %v1248_v28  ;;  %v4060_v45 = vpop.f32.mrb[15].mxu1  ;;  %v4065_v50 = vpop.f32.mrb[15].mxu0  ;;  %v1656_v4 = vsel %vm1628_vm3, %v4814_v49, -inf }
 0x3e2   :  { %1657 = vmax.xlane.f32.xlu0 %v1656_v4  ;;  %v4846_v37 = vpop.permute.xlu1 %2109 }
 0x3e3   :  { %v4818_v29 = vadd.f32 %v1587_v38, %v1567_v21  ;;  %v4821_v52 = vadd.f32 %v4767_v32, %v1566_v43 }
 0x3e4   :  { %v1324_v53 = vpop.f32.mrb[16].mxu1  ;;  %v1400_v56 = vpop.f32.mrb[16].mxu0 }
 0x3e5   :  { %v1568_v48 = vmul.f32 0.25, %v1324_v53  ;;  %v1569_v11 = vmul.f32 0.25, %v1400_v56  ;;  %v4070_v63 = vpop.f32.mrb[17].mxu1  ;;  %v4075_v1 = vpop.f32.mrb[17].mxu0  ;;  %v1662_v2 = vsel %vm1628_vm3, %v4818_v29, -inf  ;;  %v1659_v5 = vsel %vm1628_vm3, %v4821_v52, -inf }
 0x3e6   :  { %1663 = vmax.xlane.f32.xlu0 %v1662_v2  ;;  %1660 = vmax.xlane.f32.xlu1 %v1659_v5  ;;  %v4848_v41 = vpop.permute.xlu1 %2185 }
 0x3e7   :  { %v4828_v38 = vadd.f32 %v4770_v34, %v1569_v11  ;;  %v4830_v7 = vadd.f32 %v1591_v6, %v1568_v48 }
 0x3e8   :  { %v1476_v32 = vpop.f32.mrb[18].mxu1  ;;  %v1552_v8 = vpop.f32.mrb[18].mxu0 }
 0x3e9   :  { %v1570_v13 = vmul.f32 0.25, %v1476_v32  ;;  %v1571_v22 = vmul.f32 0.25, %v1552_v8  ;;  %v4080_v18 = vpop.f32.mrb[19].mxu1  ;;  %v4085_v58 = vpop.f32.mrb[19].mxu0  ;;  %v1668_v17 = vsel %vm1628_vm3, %v4828_v38, -inf  ;;  %v1665_v27 = vsel %vm1628_vm3, %v4830_v7, -inf }
 0x3ea   :  { %1669 = vmax.xlane.f32.xlu0 %v1668_v17  ;;  %1666 = vmax.xlane.f32.xlu1 %v1665_v27 }
 0x3eb   :  { %v4836_v30 = vadd.f32 %v1603_v3, %v1571_v22  ;;  %v4838_v34 = vadd.f32 %v1599_v12, %v1570_v13  ;;  %v4852_v3 = vpop.permute.xlu1 %2261  ;;  %v4856_v12 = vpop.permute.xlu0 %2033 }
 0x3ed   :  { %v1674_v6 = vsel %vm1628_vm3, %v4836_v30, -inf  ;;  %v1671_v33 = vsel %vm1628_vm3, %v4838_v34, -inf }
 0x3ee   :  { %1675 = vmax.xlane.f32.xlu0 %v1674_v6  ;;  %1672 = vmax.xlane.f32.xlu1 %v1671_v33 }
 0x3ef   :  { %v4860_v14 = vpop.permute.xlu1 %2413  ;;  %v4862_v42 = vpop.permute.xlu0 %2337 }
 0x3ff   :  { %2717 = vrot.lane.b32.xlu1 %v4622_v24, %s4387_s12 }
 0x404   :  { %2641 = vrot.lane.b32.xlu0 %v4612_v19, %s4387_s12 }
 0x408   :  { %2793 = vrot.lane.b32.xlu0 %v4620_v23, %s4387_s12 }
 0x40d   :  { %v1631_v28 = vpop.xlane.xlu1 %1630 }
 0x40e   :  { %v1677_v43 = vsub.f32 %v4756_v10, %v1631_v28 }
 0x410   :  { %v1693_v21 = vmul.f32 1.442695, %v1677_v43 }
 0x411   :  { %v1634_v45 = vpop.xlane.xlu0 %1633  ;;  %v4889_v22 = vpop.permute.xlu1 %2565 }
 0x412   :  { %v1678_v24 = vsub.f32 %v4764_v31, %v1634_v45  ;;  %4266 = vpow2.f32 %v1693_v21 }
 0x414   :  { %v1695_v50 = vmul.f32 1.442695, %v1678_v24 }
 0x415   :  { %v1637_v4 = vpop.xlane.xlu0 %1636 }
 0x416   :  { %v1679_v19 = vsub.f32 %v4775_v44, %v1637_v4  ;;  %4268 = vpow2.f32 %v1695_v50 }
 0x418   :  { %v1697_v53 = vmul.f32 1.442695, %v1679_v19 }
 0x419   :  { %v1646_v56 = vpop.xlane.xlu0 %1645 }
 0x41a   :  { %4270 = vpow2.f32 %v1697_v53  ;;  %v1682_v23 = vsub.f32 %v4780_v51, %v1646_v56 }
 0x41c   :  { %v1703_v48 = vmul.f32 1.442695, %v1682_v23  ;;  %v4869_v63 = vpop.eup %4266 }
 0x41d   :  { %v1640_v11 = vpop.xlane.xlu0 %1639  ;;  %v1725_v31 = vsel %vm1628_vm3, %v4869_v63, 0.0 }
 0x41e   :  { %4272 = vpow2.f32 %v1703_v48  ;;  %v1680_v10 = vsub.f32 %v4785_v39, %v1640_v11 }
 0x420   :  { %v1699_v1 = vmul.f32 1.442695, %v1680_v10  ;;  %v4873_v2 = vpop.eup %4268 }
 0x421   :  { %v1728_v51 = vsel %vm1628_vm3, %v4873_v2, 0.0  ;;  %v4893_v28 = vpop.permute.xlu0 %2489 }
 0x422   :  { %4274 = vpow2.f32 %v1699_v1 }
 0x423   :  { %1726 = vadd.xlane.f32.xlu1 %v1725_v31 }
 0x424   :  { %v4875_v44 = vpop.eup %4270 }
 0x425   :  { %v1731_v5 = vsel %vm1628_vm3, %v4875_v44, 0.0 }
 0x427   :  { %1729 = vadd.xlane.f32.xlu0 %v1728_v51  ;;  %1732 = vadd.xlane.f32.xlu1 %v1731_v5 }
 0x428   :  { %v4881_v39 = vpop.eup %4272 }
 0x429   :  { %v1740_v32 = vsel %vm1628_vm3, %v4881_v39, 0.0 }
 0x42b   :  { %1741 = vadd.xlane.f32.xlu0 %v1740_v32 }
 0x42c   :  { %v4885_v8 = vpop.eup %4274 }
 0x42d   :  { %v1734_v13 = vsel %vm1628_vm3, %v4885_v8, 0.0 }
 0x42f   :  { %1735 = vadd.xlane.f32.xlu0 %v1734_v13 }
 0x442   :  { %v1643_v18 = vpop.xlane.xlu1 %1642 }
 0x443   :  { %v1681_v58 = vsub.f32 %v4794_v59, %v1643_v18 }
 0x445   :  { %v1701_v17 = vmul.f32 1.442695, %v1681_v58 }
 0x446   :  { %v1649_v27 = vpop.xlane.xlu1 %1648 }
 0x447   :  { %4276 = vpow2.f32 %v1701_v17  ;;  %v1683_v6 = vsub.f32 %v4799_v15, %v1649_v27 }
 0x449   :  { %v1705_v33 = vmul.f32 1.442695, %v1683_v6 }
 0x44b   :  { %4278 = vpow2.f32 %v1705_v33 }
 0x451   :  { %v4895_v43 = vpop.eup %4276 }
 0x452   :  { %v1652_v21 = vpop.xlane.xlu0 %1651  ;;  %v1737_v45 = vsel %vm1628_vm3, %v4895_v43, 0.0 }
 0x453   :  { %v1684_v24 = vsub.f32 %v4804_v16, %v1652_v21  ;;  %1738 = vadd.xlane.f32.xlu1 %v1737_v45 }
 0x455   :  { %v4900_v50 = vpop.eup %4278  ;;  %v1707_v59 = vmul.f32 1.442695, %v1684_v24 }
 0x456   :  { %v1743_v4 = vsel %vm1628_vm3, %v4900_v50, 0.0 }
 0x457   :  { %4280 = vpow2.f32 %v1707_v59  ;;  %1744 = vadd.xlane.f32.xlu1 %v1743_v4 }
 0x461   :  { %v4904_v15 = vpop.eup %4280 }
 0x462   :  { %v1746_v19 = vsel %vm1628_vm3, %v4904_v15, 0.0 }
 0x463   :  { %1747 = vadd.xlane.f32.xlu0 %v1746_v19 }
 0x46b   :  { %v1655_v53 = vpop.xlane.xlu1 %1654 }
 0x46c   :  { %v1685_v56 = vsub.f32 %v4809_v35, %v1655_v53 }
 0x46e   :  { %v1709_v23 = vmul.f32 1.442695, %v1685_v56 }
 0x46f   :  { %v1658_v16 = vpop.xlane.xlu0 %1657 }
 0x470   :  { %4282 = vpow2.f32 %v1709_v23  ;;  %v1686_v48 = vsub.f32 %v4814_v49, %v1658_v16 }
 0x472   :  { %v1711_v11 = vmul.f32 1.442695, %v1686_v48 }
 0x473   :  { %v1664_v10 = vpop.xlane.xlu0 %1663  ;;  %v1661_v1 = vpop.xlane.xlu1 %1660 }
 0x474   :  { %4284 = vpow2.f32 %v1711_v11  ;;  %v1688_v31 = vsub.f32 %v4818_v29, %v1664_v10  ;;  %v1687_v51 = vsub.f32 %v4821_v52, %v1661_v1 }
 0x476   :  { %v1715_v5 = vmul.f32 1.442695, %v1688_v31  ;;  %v1713_v32 = vmul.f32 1.442695, %v1687_v51 }
 0x477   :  { %v1670_v13 = vpop.xlane.xlu0 %1669  ;;  %v1667_v18 = vpop.xlane.xlu1 %1666 }
 0x478   :  { %4286 = vpow2.f32 %v1715_v5  ;;  %v1690_v35 = vsub.f32 %v4828_v38, %v1670_v13  ;;  %v1689_v58 = vsub.f32 %v4830_v7, %v1667_v18 }
 0x479   :  { %4288 = vpow2.f32 %v1713_v32 }
 0x47a   :  { %v4914_v17 = vpop.eup %4282  ;;  %v1719_v49 = vmul.f32 1.442695, %v1690_v35  ;;  %v1717_v27 = vmul.f32 1.442695, %v1689_v58 }
 0x47b   :  { %v1676_v6 = vpop.xlane.xlu0 %1675  ;;  %v1673_v33 = vpop.xlane.xlu1 %1672  ;;  %v1749_v29 = vsel %vm1628_vm3, %v4914_v17, 0.0 }
 0x47c   :  { %4290 = vpow2.f32 %v1719_v49  ;;  %v1692_v52 = vsub.f32 %v4836_v30, %v1676_v6  ;;  %v1691_v21 = vsub.f32 %v4838_v34, %v1673_v33  ;;  %1750 = vadd.xlane.f32.xlu1 %v1749_v29 }
 0x47d   :  { %4292 = vpow2.f32 %v1717_v27 }
 0x47e   :  { %v4920_v38 = vpop.eup %4284  ;;  %v1723_v7 = vmul.f32 1.442695, %v1692_v52  ;;  %v1721_v45 = vmul.f32 1.442695, %v1691_v21 }
 0x47f   :  { %v1752_v24 = vsel %vm1628_vm3, %v4920_v38, 0.0  ;;  %v4952_v1 = vpop.permute.xlu0 %2641  ;;  %v4954_v31 = vpop.permute.xlu1 %2717 }
 0x480   :  { %4294 = vpow2.f32 %v1723_v7  ;;  %1753 = vadd.xlane.f32.xlu0 %v1752_v24 }
 0x481   :  { %4296 = vpow2.f32 %v1721_v45 }
 0x482   :  { %v4924_v59 = vpop.eup %4286 }
 0x483   :  { %v4926_v4 = vpop.eup %4288  ;;  %v1758_v30 = vsel %vm1628_vm3, %v4924_v59, 0.0  ;;  %v4956_v51 = vpop.permute.xlu0 %2793 }
 0x484   :  { %1759 = vadd.xlane.f32.xlu0 %v1758_v30  ;;  %v1755_v34 = vsel %vm1628_vm3, %v4926_v4, 0.0 }
 0x485   :  { %1756 = vadd.xlane.f32.xlu1 %v1755_v34 }
 0x486   :  { %v4932_v19 = vpop.eup %4290 }
 0x487   :  { %v4934_v53 = vpop.eup %4292  ;;  %v1764_v56 = vsel %vm1628_vm3, %v4932_v19, 0.0 }
 0x488   :  { %1765 = vadd.xlane.f32.xlu0 %v1764_v56  ;;  %v1761_v23 = vsel %vm1628_vm3, %v4934_v53, 0.0 }
 0x489   :  { %1762 = vadd.xlane.f32.xlu1 %v1761_v23 }
 0x48a   :  { %v4940_v16 = vpop.eup %4294 }
 0x48b   :  { %v4942_v48 = vpop.eup %4296  ;;  %v1770_v11 = vsel %vm1628_vm3, %v4940_v16, 0.0 }
 0x48c   :  { %1771 = vadd.xlane.f32.xlu0 %v1770_v11  ;;  %v1767_v10 = vsel %vm1628_vm3, %v4942_v48, 0.0 }
 0x48d   :  { %1768 = vadd.xlane.f32.xlu1 %v1767_v10 }
 0x49e   :  { %2869 = vrot.lane.b32.xlu1 %v4630_v26, %s4387_s12 }
 0x4a2   :  { %2945 = vrot.lane.b32.xlu0 %v4628_v25, %s4387_s12 }
 0x4b0   :  { %v1727_v5 = vpop.xlane.xlu1 %1726 }
 0x4b1   :  { %4298 = vrcp.f32 %v1727_v5 }
 0x4b4   :  { %v1730_v32 = vpop.xlane.xlu0 %1729  ;;  %v1733_v13 = vpop.xlane.xlu1 %1732 }
 0x4b5   :  { %4300 = vrcp.f32 %v1730_v32 }
 0x4b6   :  { %4302 = vrcp.f32 %v1733_v13 }
 0x4b8   :  { %v1742_v18 = vpop.xlane.xlu0 %1741 }
 0x4bb   :  { %v4299_v35 = vpop.eup %4298 }
 0x4bc   :  { %v1789_v58 = vmul.f32 %v4299_v35, %v4869_v63  ;;  %v1736_v26 = vpop.xlane.xlu0 %1735 }
 0x4bd   :  { %4304 = vrcp.f32 %v1736_v26 }
 0x4be   :  { %4089 = vmatmul.mubr.msk.f32.vlgmr.msra.gmra.mrb[20].mxu1 %vm1628_vm3, %v1789_v58  ;;  %4306 = vrcp.f32 %v1742_v18 }
 0x4bf   :  { %v4301_v25 = vpop.eup %4300  ;;  %4097 = vmatpush3.msra.mxu1 %v4844_v36  ;;  %4098 = vmatprep.mubr.msk.f32.mxu1 %vm4386_vm1, %v4385_v9 }
 0x4c0   :  { %v4303_v49 = vpop.eup %4302  ;;  %v1790_v27 = vmul.f32 %v4301_v25, %v4873_v2  ;;  %4106 = vmatprep.subr.mxu1 %v4385_v9 }
 0x4c1   :  { %v1791_v6 = vmul.f32 %v4303_v49, %v4875_v44 }
 0x4c2   :  { %4094 = vmatmul.mubr.msk.f32.vlgmr.msra.gmra.mrb[20].mxu0 %vm1628_vm3, %v1790_v27 }
 0x4c3   :  { %4099 = vmatmul.mubr.msk.f32.vlgmr.msra.gmra.mrb[22].mxu1 %vm1628_vm3, %v1791_v6  ;;  %4102 = vmatpush3.msra.mxu0 %v4856_v12 }
 0x4c4   :  { %4107 = vmatpush3.msra.mxu1 %v4846_v37  ;;  %4103 = vmatprep.mubr.msk.f32.mxu0 %vm4386_vm1, %v4385_v9 }
 0x4c5   :  { %4111 = vmatprep.subr.mxu0 %v4385_v9  ;;  %4108 = vmatprep.mubr.msk.f32.mxu1 %vm4386_vm1, %v4385_v9 }
 0x4c6   :  { %4116 = vmatprep.subr.mxu1 %v4385_v9 }
 0x4c7   :  { %v4305_v36 = vpop.eup %4304 }
 0x4c8   :  { %v1792_v63 = vmul.f32 %v4305_v36, %v4885_v8  ;;  %v4307_v2 = vpop.eup %4306 }
 0x4c9   :  { %v1794_v37 = vmul.f32 %v4307_v2, %v4881_v39 }
 0x4ca   :  { %4104 = vmatmul.mubr.msk.f32.vlgmr.msra.gmra.mrb[22].mxu0 %vm1628_vm3, %v1792_v63 }
 0x4cb   :  { %4112 = vmatpush3.msra.mxu0 %v4848_v41  ;;  %4113 = vmatprep.mubr.msk.f32.mxu0 %vm4386_vm1, %v4385_v9 }
 0x4cc   :  { %4121 = vmatprep.subr.mxu0 %v4385_v9 }
 0x4ce   :  { %4114 = vmatmul.mubr.msk.f32.vlgmr.msra.gmra.mrb[24].mxu0 %vm1628_vm3, %v1794_v37 }
 0x4cf   :  { %4122 = vmatpush3.msra.mxu0 %v4862_v42  ;;  %4123 = vmatprep.mubr.msk.f32.mxu0 %vm4386_vm1, %v4385_v9 }
 0x4d0   :  { %4131 = vmatprep.subr.mxu0 %v4385_v9 }
 0x4e0   :  { %v1739_v12 = vpop.xlane.xlu1 %1738 }
 0x4e1   :  { %4308 = vrcp.f32 %v1739_v12 }
 0x4e4   :  { %v1745_v44 = vpop.xlane.xlu1 %1744 }
 0x4e5   :  { %4310 = vrcp.f32 %v1745_v44 }
 0x4eb   :  { %v4309_v41 = vpop.eup %4308 }
 0x4ec   :  { %v1793_v8 = vmul.f32 %v4309_v41, %v4895_v43 }
 0x4ee   :  { %4109 = vmatmul.mubr.msk.f32.vlgmr.msra.gmra.mrb[24].mxu1 %vm1628_vm3, %v1793_v8 }
 0x4ef   :  { %v4311_v39 = vpop.eup %4310  ;;  %4117 = vmatpush3.msra.mxu1 %v4852_v3  ;;  %4118 = vmatprep.mubr.msk.f32.mxu1 %vm4386_vm1, %v4385_v9 }
 0x4f0   :  { %v1795_v42 = vmul.f32 %v4311_v39, %v4900_v50  ;;  %v1748_v33 = vpop.xlane.xlu0 %1747  ;;  %4126 = vmatprep.subr.mxu1 %v4385_v9 }
 0x4f1   :  { %4312 = vrcp.f32 %v1748_v33 }
 0x4f2   :  { %4119 = vmatmul.mubr.msk.f32.vlgmr.msra.gmra.mrb[26].mxu1 %vm1628_vm3, %v1795_v42 }
 0x4f3   :  { %4127 = vmatpush3.msra.mxu1 %v4860_v14  ;;  %4128 = vmatprep.mubr.msk.f32.mxu1 %vm4386_vm1, %v4385_v9 }
 0x4f4   :  { %4136 = vmatprep.subr.mxu1 %v4385_v9 }
 0x4fb   :  { %v4313_v43 = vpop.eup %4312 }
 0x4fc   :  { %v1796_v3 = vmul.f32 %v4313_v43, %v4904_v15 }
 0x4fe   :  { %4124 = vmatmul.mubr.msk.f32.vlgmr.msra.gmra.mrb[26].mxu0 %vm1628_vm3, %v1796_v3 }
 0x4ff   :  { %4132 = vmatpush3.msra.mxu0 %v4893_v28  ;;  %4133 = vmatprep.mubr.msk.f32.mxu0 %vm4386_vm1, %v4385_v9 }
 0x500   :  { %4141 = vmatprep.subr.mxu0 %v4385_v9 }
 0x509   :  { %v1751_v50 = vpop.xlane.xlu1 %1750 }
 0x50a   :  { %4314 = vrcp.f32 %v1751_v50 }
 0x50d   :  { %v1754_v14 = vpop.xlane.xlu0 %1753 }
 0x50e   :  { %4316 = vrcp.f32 %v1754_v14 }
 0x511   :  { %v1760_v29 = vpop.xlane.xlu0 %1759 }
 0x512   :  { %4318 = vrcp.f32 %v1760_v29  ;;  %v1757_v52 = vpop.xlane.xlu1 %1756 }
 0x513   :  { %4320 = vrcp.f32 %v1757_v52 }
 0x514   :  { %v4315_v21 = vpop.eup %4314 }
 0x515   :  { %v1797_v15 = vmul.f32 %v4315_v21, %v4914_v17  ;;  %v1766_v7 = vpop.xlane.xlu0 %1765 }
 0x516   :  { %4322 = vrcp.f32 %v1766_v7  ;;  %v1763_v45 = vpop.xlane.xlu1 %1762 }
 0x517   :  { %4324 = vrcp.f32 %v1763_v45  ;;  %4129 = vmatmul.mubr.msk.f32.vlgmr.msra.gmra.mrb[28].mxu1 %vm1628_vm3, %v1797_v15 }
 0x518   :  { %v4317_v28 = vpop.eup %4316  ;;  %4137 = vmatpush3.msra.mxu1 %v4889_v22  ;;  %4138 = vmatprep.mubr.msk.f32.mxu1 %vm4386_vm1, %v4385_v9 }
 0x519   :  { %v1798_v24 = vmul.f32 %v4317_v28, %v4920_v38  ;;  %v1772_v30 = vpop.xlane.xlu0 %1771  ;;  %4146 = vmatprep.subr.mxu1 %v4385_v9 }
 0x51a   :  { %4326 = vrcp.f32 %v1772_v30  ;;  %v1769_v34 = vpop.xlane.xlu1 %1768 }
 0x51b   :  { %4328 = vrcp.f32 %v1769_v34  ;;  %4134 = vmatmul.mubr.msk.f32.vlgmr.msra.gmra.mrb[28].mxu0 %vm1628_vm3, %v1798_v24 }
 0x51c   :  { %v4319_v17 = vpop.eup %4318  ;;  %4142 = vmatpush3.msra.mxu0 %v4952_v1  ;;  %4143 = vmatprep.mubr.msk.f32.mxu0 %vm4386_vm1, %v4385_v9 }
 0x51d   :  { %v4321_v22 = vpop.eup %4320  ;;  %v1800_v56 = vmul.f32 %v4319_v17, %v4924_v59  ;;  %4151 = vmatprep.subr.mxu0 %v4385_v9  ;;  %v5030_v59 = vld [vmem:[%s5354_s2 + $0x4] ss:$8 sps:$4 sm:$0xff]   ;;  %v2946_v1 = vpop.permute.xlu0 %2945 }
 0x51e   :  { %v1799_v38 = vmul.f32 %v4321_v22, %v4926_v4 }
 0x51f   :  { %4144 = vmatmul.mubr.msk.f32.vlgmr.msra.gmra.mrb[30].mxu0 %vm1628_vm3, %v1800_v56 }
 0x520   :  { %v4323_v23 = vpop.eup %4322  ;;  %4139 = vmatmul.mubr.msk.f32.vlgmr.msra.gmra.mrb[30].mxu1 %vm1628_vm3, %v1799_v38  ;;  %4152 = vmatpush3.msra.mxu0 %v4956_v51 }
 0x521   :  { %v4325_v11 = vpop.eup %4324  ;;  %v1802_v10 = vmul.f32 %v4323_v23, %v4932_v19  ;;  %4147 = vmatpush3.msra.mxu1 %v4954_v31  ;;  %4148 = vmatprep.mubr.msk.f32.mxu1 %vm4386_vm1, %v4385_v9  ;;  %v2870_v31 = vpop.permute.xlu1 %2869 }
 0x522   :  { %v1801_v4 = vmul.f32 %v4325_v11, %v4934_v53  ;;  %4153 = vmatprep.mubr.msk.f32.mxu0 %vm4386_vm1, %v4385_v9  ;;  %4156 = vmatprep.subr.mxu1 %v4385_v9  ;;  %v5042_v53 = vld [vmem:[%s5354_s2 + $0x14] ss:$8 sps:$4 sm:$0xff]  }
 0x523   :  { %4161 = vmatprep.subr.mxu0 %v4385_v9  ;;  %4154 = vmatmul.mubr.msk.f32.vlgmr.msra.gmra.mrb[32].mxu0 %vm1628_vm3, %v1802_v10 }
 0x524   :  { %v4327_v19 = vpop.eup %4326  ;;  %4149 = vmatmul.mubr.msk.f32.vlgmr.msra.gmra.mrb[32].mxu1 %vm1628_vm3, %v1801_v4  ;;  %4162 = vmatpush3.msra.mxu0 %v2946_v1 }
 0x525   :  { %v4329_v51 = vpop.eup %4328  ;;  %v1804_v5 = vmul.f32 %v4327_v19, %v4940_v16  ;;  %4157 = vmatpush3.msra.mxu1 %v2870_v31  ;;  %4158 = vmatprep.mubr.msk.f32.mxu1 %vm4386_vm1, %v4385_v9  ;;  %v4380_v16 = vld [vmem:[%s5354_s2] ss:$8 sps:$4 sm:$0xff]  }
 0x526   :  { %v1803_v32 = vmul.f32 %v4329_v51, %v4942_v48  ;;  %4163 = vmatprep.mubr.msk.f32.mxu0 %vm4386_vm1, %v4385_v9  ;;  %4178 = vmatprep.subr.bf16.mxu0 %v5030_v59  ;;  %v4381_v48 = vld [vmem:[%s5354_s2 + $0x10] ss:$8 sps:$4 sm:$0xff]  }
 0x527   :  { %4164 = vmatmul.mubr.msk.f32.vlgmr.msra.gmra.mrb[34].mxu0 %vm1628_vm3, %v1804_v5  ;;  %3065 = vrot.lane.b32.xlu1 %v4380_v16, %s4389_s20 }
 0x528   :  { %4159 = vmatmul.mubr.msk.f32.vlgmr.msra.gmra.mrb[34].mxu1 %vm1628_vm3, %v1803_v32  ;;  %4179 = vmatpush3.bf16.msra.mxu0 %v5030_v59 }
 0x529   :  { %4180 = vmatprep.subr.bf16.mxu0 %v5042_v53 }
 0x52b   :  { %3067 = vrot.lane.b32.xlu1 %v4381_v48, %s4389_s20 }
 0x52c   :  { %4181 = vmatpush3.bf16.msra.mxu0 %v5042_v53 }
 0x52d   :  { %4206 = vmatprep.subr.bf16.mxu0 %v4385_v9 }
 0x591   :  { %v1877_v13 = vpop.f32.mrb[20].mxu1 }
 0x592   :  { %v4090_v18 = vpop.f32.mrb[21].mxu1 }
 0x595   :  { %v1953_v35 = vpop.f32.mrb[20].mxu0 }
 0x596   :  { %v2029_v58 = vpop.f32.mrb[22].mxu1  ;;  %v4095_v26 = vpop.f32.mrb[21].mxu0 }
 0x597   :  { %v4100_v25 = vpop.f32.mrb[23].mxu1 }
 0x599   :  { %v3066_v8 = vpop.permute.xlu1 %3065 }
 0x59a   :  { %4166 = vmatprep.subr.bf16.mxu1 %v3066_v8 }
 0x59b   :  { %4167 = vmatpush3.bf16.msra.mxu1 %v3066_v8 }
 0x59d   :  { %v2105_v49 = vpop.f32.mrb[22].mxu0  ;;  %v3068_v39 = vpop.permute.xlu1 %3067 }
 0x59e   :  { %v4105_v27 = vpop.f32.mrb[23].mxu0  ;;  %4168 = vmatprep.subr.bf16.mxu1 %v3068_v39 }
 0x59f   :  { %4169 = vmatpush3.bf16.msra.mxu1 %v3068_v39 }
 0x5a1   :  { %v2257_v6 = vpop.f32.mrb[24].mxu0 }
 0x5a2   :  { %v4115_v36 = vpop.f32.mrb[25].mxu0 }
 0x5c1   :  { %v2181_v63 = vpop.f32.mrb[24].mxu1 }
 0x5c2   :  { %v4110_v2 = vpop.f32.mrb[25].mxu1 }
 0x5c5   :  { %v2333_v37 = vpop.f32.mrb[26].mxu1 }
 0x5c6   :  { %v4120_v12 = vpop.f32.mrb[27].mxu1 }
 0x5d1   :  { %v2409_v44 = vpop.f32.mrb[26].mxu0 }
 0x5d2   :  { %v4125_v41 = vpop.f32.mrb[27].mxu0 }
 0x5ea   :  { %v2485_v42 = vpop.f32.mrb[28].mxu1 }
 0x5eb   :  { %v4130_v33 = vpop.f32.mrb[29].mxu1 }
 0x5ee   :  { %v2561_v43 = vpop.f32.mrb[28].mxu0 }
 0x5ef   :  { %v4222_v3 = vpack.i.bf16 %v2561_v43, %v2485_v42  ;;  %v4135_v50 = vpop.f32.mrb[29].mxu0 }
 0x5f1   :  { %4223 = vrot.lane.b32.xlu0 %v4222_v3, %s4390_s23 }
 0x5f2   :  { %v2713_v14 = vpop.f32.mrb[30].mxu0 }
 0x5f3   :  { %v2637_v29 = vpop.f32.mrb[30].mxu1  ;;  %v4145_v52 = vpop.f32.mrb[31].mxu0 }
 0x5f4   :  { %v4227_v21 = vpack.i.bf16 %v2713_v14, %v2637_v29  ;;  %v4140_v15 = vpop.f32.mrb[31].mxu1 }
 0x5f6   :  { %4228 = vrot.lane.b32.xlu0 %v4227_v21, %s4390_s23  ;;  %v2865_v7 = vpop.f32.mrb[32].mxu0 }
 0x5f7   :  { %v2789_v45 = vpop.f32.mrb[32].mxu1  ;;  %v4155_v28 = vpop.f32.mrb[33].mxu0 }
 0x5f8   :  { %v4232_v24 = vpack.i.bf16 %v2865_v7, %v2789_v45  ;;  %v4150_v30 = vpop.f32.mrb[33].mxu1 }
 0x5fa   :  { %4233 = vrot.lane.b32.xlu1 %v4232_v24, %s4390_s23  ;;  %v3017_v34 = vpop.f32.mrb[34].mxu0 }
 0x5fb   :  { %v2941_v17 = vpop.f32.mrb[34].mxu1  ;;  %v4165_v22 = vpop.f32.mrb[35].mxu0 }
 0x5fc   :  { %v4237_v56 = vpack.i.bf16 %v3017_v34, %v2941_v17  ;;  %v4160_v38 = vpop.f32.mrb[35].mxu1 }
 0x5fe   :  { %4238 = vrot.lane.b32.xlu0 %v4237_v56, %s4390_s23  ;;  %3072 = vrot.lane.b32.xlu1 %v4556_v0, %s4389_s20 }
 0x663   :  { %v4224_v23 = vpop.permute.xlu0 %4223 }
 0x664   :  { %v4226_v11 = vunpack.i.h.bf16 %v4224_v23  ;;  %v4225_v10 = vunpack.i.l.bf16 %v4224_v23 }
 0x666   :  { %v3054_v4 = vsel %vm341_vm2, %v1953_v35, %v4226_v11  ;;  %v3053_v1 = vsel %vm341_vm2, %v1877_v13, %v4225_v10 }
 0x667   :  { %v3061_v19 = vpack.c.bf16 %v3054_v4, %v3053_v1 }
 0x668   :  { %v4229_v31 = vpop.permute.xlu0 %4228 }
 0x669   :  { %v4231_v51 = vunpack.i.h.bf16 %v4229_v31  ;;  %v4230_v5 = vunpack.i.l.bf16 %v4229_v31  ;;  %4170 = vmatprep.mubr.msk.bf16.mxu1 %vm35_vm0, %v3061_v19 }
 0x66b   :  { %v3056_v32 = vsel %vm341_vm2, %v2105_v49, %v4231_v51  ;;  %v3055_v16 = vsel %vm341_vm2, %v2029_v58, %v4230_v5 }
 0x66c   :  { %v3062_v48 = vpack.c.bf16 %v3056_v32, %v3055_v16  ;;  %v4234_v18 = vpop.permute.xlu1 %4233 }
 0x66d   :  { %v4236_v0 = vunpack.i.h.bf16 %v4234_v18  ;;  %v4235_v26 = vunpack.i.l.bf16 %v4234_v18 }
 0x66e   :  { %4171 = vmatmul.mubr.msk.bf16.vlgmr.msra.gmra.mrb[36].mxu1 %vm35_vm0, %v3062_v48 }
 0x66f   :  { %v3058_v35 = vsel %vm341_vm2, %v2257_v6, %v4236_v0  ;;  %v3057_v13 = vsel %vm341_vm2, %v2181_v63, %v4235_v26 }
 0x670   :  { %v3063_v25 = vpack.c.bf16 %v3058_v35, %v3057_v13  ;;  %v4239_v27 = vpop.permute.xlu0 %4238  ;;  %v3073_v41 = vpop.permute.xlu1 %3072 }
 0x671   :  { %v4241_v36 = vunpack.i.h.bf16 %v4239_v27  ;;  %v4240_v2 = vunpack.i.l.bf16 %v4239_v27 }
 0x672   :  { %4174 = vmatprep.mubr.msk.bf16.mxu1 %vm35_vm0, %v3063_v25 }
 0x673   :  { %v3060_v49 = vsel %vm341_vm2, %v2409_v44, %v4241_v36  ;;  %v3059_v58 = vsel %vm341_vm2, %v2333_v37, %v4240_v2 }
 0x674   :  { %v3064_v12 = vpack.c.bf16 %v3060_v49, %v3059_v58 }
 0x676   :  { %4175 = vmatmul.mubr.msk.bf16.gmra.mrb[40].mxu1 %vm35_vm0, %v3064_v12 }
 0x741   :  { %v4172_v8 = vpop.f32.mrb[36].mxu1 }
 0x742   :  { %v3121_v39 = vpop.f32.mrb[37].mxu1  ;;  %v3130_v33 = vadd.f32 %v4172_v8, %v3073_v41 }
 0x743   :  { %v3122_v42 = vadd.f32 %v3121_v39, %v3073_v41  ;;  %v4173_v6 = vpop.f32.mrb[38].mxu1 }
 0x744   :  { %v3124_v63 = vpop.f32.mrb[39].mxu1  ;;  %v3133_v50 = vadd.f32 %v4173_v6, %v3073_v41  ;;  %v3154_v37 = vadd.f32 %v3130_v33, %v4523_v46 }
 0x745   :  { %v3125_v43 = vadd.f32 %v3124_v63, %v3073_v41  ;;  %v3152_v3 = vadd.f32 %v3122_v42, %v4512_v40 }
 0x746   :  { %v3155_v15 = vadd.f32 %v3133_v50, %v4525_v47  ;;  %v3166_v28 = vsel %vm35_vm0, %v3154_v37, 0.0 }
 0x747   :  { %v3153_v14 = vadd.f32 %v3125_v43, %v4514_v20  ;;  %v3160_v44 = vsel %vm35_vm0, %v3152_v3, 0.0 }
 0x748   :  { %3161 = vadd.xlane.f32.xlu0 %v3160_v44  ;;  %v3169_v17 = vsel %vm35_vm0, %v3155_v15, 0.0 }
 0x749   :  { %v4176_v29 = vpop.f32.mrb[40].mxu1  ;;  %v3163_v52 = vsel %vm35_vm0, %v3153_v14, 0.0 }
 0x74a   :  { %3164 = vadd.xlane.f32.xlu1 %v3163_v52  ;;  %v3137_v21 = vpop.f32.mrb[41].mxu1  ;;  %v3146_v30 = vadd.f32 %v4176_v29, %v3073_v41  ;;  %v4248_v52 = vld [vmem:[%s5354_s2 + $0x24] ss:$8 sps:$4 sm:$0xff]  }
 0x74b   :  { %v3138_v7 = vadd.f32 %v3137_v21, %v3073_v41  ;;  %v4177_v45 = vpop.f32.mrb[42].mxu1  ;;  %v4249_v21 = vld [vmem:[%s5354_s2 + $0x34] ss:$8 sps:$4 sm:$0xff]  }
 0x74c   :  { %3167 = vadd.xlane.f32.xlu0 %v3166_v28  ;;  %v3140_v40 = vpop.f32.mrb[43].mxu1  ;;  %v3149_v24 = vadd.f32 %v4177_v45, %v3073_v41  ;;  %v3158_v56 = vadd.f32 %v3146_v30, %v4544_v61 }
 0x74d   :  { %v3141_v20 = vadd.f32 %v3140_v40, %v3073_v41  ;;  %v3156_v34 = vadd.f32 %v3138_v7, %v4534_v54 }
 0x74e   :  { %v3159_v22 = vadd.f32 %v3149_v24, %v4546_v62  ;;  %v3178_v54 = vsel %vm35_vm0, %v3158_v56, 0.0 }
 0x74f   :  { %v3157_v46 = vadd.f32 %v3141_v20, %v4536_v55  ;;  %v3172_v38 = vsel %vm35_vm0, %v3156_v34, 0.0 }
 0x750   :  { %3170 = vadd.xlane.f32.xlu0 %v3169_v17  ;;  %v3181_v23 = vsel %vm35_vm0, %v3159_v22, 0.0 }
 0x751   :  { %v3175_v47 = vsel %vm35_vm0, %v3157_v46, 0.0 }
 0x752   :  { %3176 = vadd.xlane.f32.xlu1 %v3175_v47 }
 0x754   :  { %3173 = vadd.xlane.f32.xlu0 %v3172_v38 }
 0x756   :  { %3182 = vadd.xlane.f32.xlu1 %v3181_v23 }
 0x758   :  { %3179 = vadd.xlane.f32.xlu0 %v3178_v54 }
 0x7d5   :  { %v3162_v55 = vpop.xlane.xlu0 %3161 }
 0x7d6   :  { %v3184_v11 = vmul.f32 0.03125, %v3162_v55 }
 0x7d7   :  { %v3165_v10 = vpop.xlane.xlu1 %3164 }
 0x7d8   :  { %v5095_v62 = vsub.f32 %v3152_v3, %v3184_v11  ;;  %v3185_v19 = vmul.f32 0.03125, %v3165_v10 }
 0x7d9   :  { %v3168_v4 = vpop.xlane.xlu0 %3167 }
 0x7da   :  { %v3186_v1 = vmul.f32 0.03125, %v3168_v4  ;;  %v5101_v32 = vsub.f32 %v3153_v14, %v3185_v19  ;;  %v3200_v48 = vmul.f32 %v5095_v62, %v5095_v62 }
 0x7dc   :  { %v5097_v31 = vsub.f32 %v3154_v37, %v3186_v1  ;;  %v3208_v25 = vsel %vm35_vm0, %v3200_v48, 0.0  ;;  %v3201_v27 = vmul.f32 %v5101_v32, %v5101_v32 }
 0x7dd   :  { %v3171_v61 = vpop.xlane.xlu0 %3170 }
 0x7de   :  { %v3187_v51 = vmul.f32 0.03125, %v3171_v61  ;;  %v3202_v5 = vmul.f32 %v5097_v31, %v5097_v31  ;;  %v3211_v39 = vsel %vm35_vm0, %v3201_v27, 0.0 }
 0x7df   :  { %v3177_v16 = vpop.xlane.xlu1 %3176 }
 0x7e0   :  { %v5105_v18 = vsub.f32 %v3155_v15, %v3187_v51  ;;  %v3214_v0 = vsel %vm35_vm0, %v3202_v5, 0.0  ;;  %v3189_v36 = vmul.f32 0.03125, %v3177_v16 }
 0x7e1   :  { %3215 = vadd.xlane.f32.xlu0 %v3214_v0  ;;  %v3174_v26 = vpop.xlane.xlu0 %3173 }
 0x7e2   :  { %v3203_v35 = vmul.f32 %v5105_v18, %v5105_v18  ;;  %v3188_v2 = vmul.f32 0.03125, %v3174_v26  ;;  %v5117_v42 = vsub.f32 %v3157_v46, %v3189_v36 }
 0x7e3   :  { %v3183_v13 = vpop.xlane.xlu1 %3182 }
 0x7e4   :  { %v3191_v49 = vmul.f32 0.03125, %v3183_v13  ;;  %v3217_v58 = vsel %vm35_vm0, %v3203_v35, 0.0  ;;  %v5119_v6 = vsub.f32 %v3156_v34, %v3188_v2  ;;  %v3205_v14 = vmul.f32 %v5117_v42, %v5117_v42 }
 0x7e5   :  { %3218 = vadd.xlane.f32.xlu1 %v3217_v58  ;;  %3209 = vadd.xlane.f32.xlu0 %v3208_v25  ;;  %v3180_v12 = vpop.xlane.xlu0 %3179 }
 0x7e6   :  { %v5114_v41 = vsub.f32 %v3159_v22, %v3191_v49  ;;  %v3190_v8 = vmul.f32 0.03125, %v3180_v12  ;;  %v3204_v44 = vmul.f32 %v5119_v6, %v5119_v6  ;;  %v3223_v37 = vsel %vm35_vm0, %v3205_v14, 0.0 }
 0x7e8   :  { %v5121_v33 = vsub.f32 %v3158_v56, %v3190_v8  ;;  %v3207_v63 = vmul.f32 %v5114_v41, %v5114_v41  ;;  %v3220_v29 = vsel %vm35_vm0, %v3204_v44, 0.0 }
 0x7e9   :  { %3212 = vadd.xlane.f32.xlu1 %v3211_v39 }
 0x7ea   :  { %v3206_v43 = vmul.f32 %v5121_v33, %v5121_v33  ;;  %v3229_v3 = vsel %vm35_vm0, %v3207_v63, 0.0 }
 0x7ec   :  { %v3226_v50 = vsel %vm35_vm0, %v3206_v43, 0.0 }
 0x7ed   :  { %3230 = vadd.xlane.f32.xlu1 %v3229_v3  ;;  %3227 = vadd.xlane.f32.xlu0 %v3226_v50 }
 0x7f1   :  { %3224 = vadd.xlane.f32.xlu1 %v3223_v37  ;;  %3221 = vadd.xlane.f32.xlu0 %v3220_v29 }
 0x802   :  { %3275 = vrot.lane.b32.xlu1 %v4497_v60, %s4389_s20 }
 0x806   :  { %3469 = vrot.lane.b32.xlu1 %v5030_v59, %s4389_s20 }
 0x807   :  { %3264 = vrot.lane.b32.xlu0 %v4497_v60, %s4387_s12 }
 0x80a   :  { %3471 = vrot.lane.b32.xlu1 %v5042_v53, %s4389_s20 }
 0x80b   :  { %3473 = vrot.lane.b32.xlu0 %v4248_v52, %s4389_s20 }
 0x80e   :  { %3475 = vrot.lane.b32.xlu1 %v4249_v21, %s4389_s20 }
 0x86e   :  { %v3216_v15 = vpop.xlane.xlu0 %3215 }
 0x86f   :  { %v3234_v7 = vmul.f32 0.03125, %v3216_v15 }
 0x871   :  { %v3242_v45 = vadd.f32 1e-12, %v3234_v7 }
 0x872   :  { %v3219_v28 = vpop.xlane.xlu1 %3218  ;;  %v3210_v60 = vpop.xlane.xlu0 %3209 }
 0x873   :  { %v3235_v40 = vmul.f32 0.03125, %v3219_v28  ;;  %v3232_v24 = vmul.f32 0.03125, %v3210_v60  ;;  %4330 = vrsqrt.f32 %v3242_v45 }
 0x875   :  { %v3243_v20 = vadd.f32 1e-12, %v3235_v40  ;;  %v3240_v30 = vadd.f32 1e-12, %v3232_v24  ;;  %v3457_v24 = vsub.s32 2, %v4488_v57 }
 0x876   :  { %v3213_v34 = vpop.xlane.xlu1 %3212 }
 0x877   :  { %4332 = vrsqrt.f32 %v3243_v20  ;;  %v3233_v46 = vmul.f32 0.03125, %v3213_v34  ;;  %v5193_v20 = vld [vmem:[%s5353_s3] sm:$0xff]  ;;  %v3292_v34 = vsub.s32 3, %v4488_v57 }
 0x878   :  { %4334 = vrsqrt.f32 %v3240_v30  ;;  %v5196_v30 = vrot.slane %v5193_v20, %v3457_v24 }
 0x879   :  { %v3241_v17 = vadd.f32 1e-12, %v3233_v46  ;;  %v5202_v46 = vrot.slane %v5193_v20, %v3292_v34 }
 0x87a   :  { %v3231_v22 = vpop.xlane.xlu1 %3230  ;;  %v3228_v47 = vpop.xlane.xlu0 %3227  ;;  %3482 = vrot.lane.b32.xlu0 %v5196_v30, %s4387_s12 }
 0x87b   :  { %4336 = vrsqrt.f32 %v3241_v17  ;;  %v3239_v56 = vmul.f32 0.03125, %v3231_v22  ;;  %v3238_v38 = vmul.f32 0.03125, %v3228_v47 }
 0x87d   :  { %v3247_v23 = vadd.f32 1e-12, %v3239_v56  ;;  %v3246_v54 = vadd.f32 1e-12, %v3238_v38  ;;  %v4331_v1 = vpop.eup %4330 }
 0x87e   :  { %v3225_v55 = vpop.xlane.xlu1 %3224  ;;  %v3222_v11 = vpop.xlane.xlu0 %3221  ;;  %v3258_v0 = vmul.f32 %v4331_v1, %v5097_v31 }
 0x87f   :  { %4338 = vrsqrt.f32 %v3247_v23  ;;  %v3237_v10 = vmul.f32 0.03125, %v3225_v55  ;;  %v3236_v4 = vmul.f32 0.03125, %v3222_v11 }
 0x880   :  { %4340 = vrsqrt.f32 %v3246_v54 }
 0x881   :  { %v4333_v19 = vpop.eup %4332  ;;  %v3245_v61 = vadd.f32 1e-12, %v3237_v10  ;;  %v3244_v51 = vadd.f32 1e-12, %v3236_v4 }
 0x882   :  { %v4335_v5 = vpop.eup %4334  ;;  %v3259_v16 = vmul.f32 %v4333_v19, %v5105_v18  ;;  %v3265_v48 = vpop.permute.xlu0 %3264 }
 0x883   :  { %v3256_v26 = vmul.f32 %v4335_v5, %v5095_v62  ;;  %4342 = vrsqrt.f32 %v3245_v61  ;;  %v3269_v13 = vmul.f32 %v3265_v48, %v3258_v0  ;;  %v3276_v36 = vpop.permute.xlu1 %3275 }
 0x884   :  { %4344 = vrsqrt.f32 %v3244_v51  ;;  %v3270_v25 = vmul.f32 %v3265_v48, %v3259_v16 }
 0x885   :  { %v4337_v35 = vpop.eup %4336  ;;  %v3267_v2 = vmul.f32 %v3265_v48, %v3256_v26  ;;  %v5155_v12 = vadd.f32 %v3276_v36, %v3269_v13 }
 0x886   :  { %v3257_v27 = vmul.f32 %v4337_v35, %v5101_v32  ;;  %v5157_v8 = vadd.f32 %v3276_v36, %v3270_v25  ;;  %v3474_v60 = vpop.permute.xlu0 %3473 }
 0x887   :  { %v5160_v39 = vadd.f32 %v3276_v36, %v3267_v2 }
 0x888   :  { %v3268_v49 = vmul.f32 %v3265_v48, %v3257_v27  ;;  %v3287_v3 = vpack.c.bf16 %v5157_v8, %v5155_v12 }
 0x889   :  { %v4339_v58 = vpop.eup %4338 }
 0x88a   :  { %v4341_v18 = vpop.eup %4340  ;;  %v3263_v31 = vmul.f32 %v4339_v58, %v5114_v41  ;;  %v5162_v62 = vadd.f32 %v3276_v36, %v3268_v49 }
 0x88b   :  { %v3262_v63 = vmul.f32 %v4341_v18, %v5121_v33 }
 0x88c   :  { %v3286_v32 = vpack.c.bf16 %v5162_v62, %v5160_v39  ;;  %v3274_v41 = vmul.f32 %v3265_v48, %v3263_v31 }
 0x88d   :  { %v4343_v43 = vpop.eup %4342  ;;  %v3273_v44 = vmul.f32 %v3265_v48, %v3262_v63 }
 0x88e   :  { %v4345_v50 = vpop.eup %4344  ;;  %v3261_v14 = vmul.f32 %v4343_v43, %v5117_v42  ;;  %4182 = vmatprep.mubr.msk.bf16.mxu0 %vm35_vm0, %v3286_v32  ;;  %v5177_v15 = vadd.f32 %v3276_v36, %v3274_v41 }
 0x88f   :  { %v3260_v37 = vmul.f32 %v4345_v50, %v5119_v6  ;;  %4183 = vmatmul.mubr.msk.bf16.vlgmr.msra.gmra.mrb[36].mxu0 %vm35_vm0, %v3287_v3  ;;  %v5175_v21 = vadd.f32 %v3276_v36, %v3273_v44  ;;  %v3470_v6 = vpop.permute.xlu1 %3469 }
 0x890   :  { %v3272_v29 = vmul.f32 %v3265_v48, %v3261_v14  ;;  %4190 = vmatprep.subr.bf16.mxu1 %v3470_v6 }
 0x891   :  { %v3271_v33 = vmul.f32 %v3265_v48, %v3260_v37  ;;  %v3289_v45 = vpack.c.bf16 %v5177_v15, %v5175_v21  ;;  %4191 = vmatpush3.bf16.msra.mxu1 %v3470_v6 }
 0x892   :  { %v5173_v52 = vadd.f32 %v3276_v36, %v3272_v29 }
 0x893   :  { %v5179_v7 = vadd.f32 %v3276_v36, %v3271_v33  ;;  %v3472_v28 = vpop.permute.xlu1 %3471 }
 0x894   :  { %4192 = vmatprep.subr.bf16.mxu1 %v3472_v28 }
 0x895   :  { %v3288_v42 = vpack.c.bf16 %v5173_v52, %v5179_v7  ;;  %4193 = vmatpush3.bf16.msra.mxu1 %v3472_v28 }
 0x896   :  { %4194 = vmatprep.subr.bf16.mxu1 %v3474_v60 }
 0x897   :  { %4186 = vmatprep.mubr.msk.bf16.mxu0 %vm35_vm0, %v3288_v42  ;;  %v3476_v40 = vpop.permute.xlu1 %3475 }
 0x898   :  { %4187 = vmatmul.mubr.msk.bf16.gmra.mrb[40].mxu0 %vm35_vm0, %v3289_v45 }
 0x899   :  { %4210 = vmatprep.mubr.msk.bf16.mxu0 %vm4386_vm1, %v4385_v9  ;;  %4195 = vmatpush3.bf16.msra.mxu1 %v3474_v60 }
 0x89a   :  { %4196 = vmatprep.subr.bf16.mxu1 %v3476_v40 }
 0x89d   :  { %4197 = vmatpush3.bf16.msra.mxu1 %v3476_v40 }
 0x962   :  { %v4184_v17 = vpop.f32.mrb[36].mxu0 }
 0x963   :  { %v5205_v22 = vadd.f32 %v4184_v17, %v5202_v46  ;;  %v3348_v47 = vpop.f32.mrb[37].mxu0 }
 0x964   :  { %v5208_v56 = vadd.f32 %v3348_v47, %v5202_v46  ;;  %v4185_v38 = vpop.f32.mrb[38].mxu0 }
 0x965   :  { %v3389_v23 = vmul.f32 0.044715, %v5205_v22  ;;  %v5212_v54 = vadd.f32 %v4185_v38, %v5202_v46  ;;  %v3351_v55 = vpop.f32.mrb[39].mxu0 }
 0x966   :  { %v3387_v11 = vmul.f32 0.044715, %v5208_v56  ;;  %v5216_v10 = vadd.f32 %v3351_v55, %v5202_v46 }
 0x967   :  { %v3397_v4 = vmul.f32 %v3389_v23, %v5205_v22  ;;  %v3390_v1 = vmul.f32 0.044715, %v5212_v54 }
 0x968   :  { %v3395_v19 = vmul.f32 %v3387_v11, %v5208_v56  ;;  %v3388_v61 = vmul.f32 0.044715, %v5216_v10 }
 0x969   :  { %v3405_v51 = vmul.f32 %v3397_v4, %v5205_v22  ;;  %v3398_v5 = vmul.f32 %v3390_v1, %v5212_v54 }
 0x96a   :  { %v3403_v16 = vmul.f32 %v3395_v19, %v5208_v56  ;;  %v3396_v48 = vmul.f32 %v3388_v61, %v5216_v10 }
 0x96b   :  { %v3413_v0 = vadd.f32 %v3405_v51, %v5205_v22  ;;  %v3406_v26 = vmul.f32 %v3398_v5, %v5212_v54  ;;  %v4188_v35 = vpop.f32.mrb[40].mxu0 }
 0x96c   :  { %v3411_v13 = vadd.f32 %v3403_v16, %v5208_v56  ;;  %v3404_v25 = vmul.f32 %v3396_v48, %v5216_v10  ;;  %v5231_v27 = vadd.f32 %v4188_v35, %v5202_v46  ;;  %v3364_v36 = vpop.f32.mrb[41].mxu0  ;;  %v3381_v48 = vmul.f32 0.5, %v5205_v22 }
 0x96d   :  { %v3421_v2 = vmul.f32 0.7978846, %v3413_v0  ;;  %v3414_v49 = vadd.f32 %v3406_v26, %v5212_v54  ;;  %v5235_v58 = vadd.f32 %v3364_v36, %v5202_v46  ;;  %v4189_v18 = vpop.f32.mrb[42].mxu0  ;;  %v3382_v0 = vmul.f32 0.5, %v5212_v54 }
 0x96e   :  { %v3419_v31 = vmul.f32 0.7978846, %v3411_v13  ;;  %v3412_v63 = vadd.f32 %v3404_v25, %v5216_v10  ;;  %v3393_v32 = vmul.f32 0.044715, %v5231_v27  ;;  %v3376_v43 = vadd.f32 %v4189_v18, %v5202_v46  ;;  %v3367_v3 = vpop.f32.mrb[43].mxu0 }
 0x96f   :  { %4346 = vtanh.f32 %v3421_v2  ;;  %v3422_v50 = vmul.f32 0.7978846, %v3414_v49  ;;  %v3391_v14 = vmul.f32 0.044715, %v5235_v58  ;;  %v3368_v44 = vadd.f32 %v3367_v3, %v5202_v46 }
 0x970   :  { %4348 = vtanh.f32 %v3419_v31  ;;  %v3420_v41 = vmul.f32 0.7978846, %v3412_v63  ;;  %v3401_v37 = vmul.f32 %v3393_v32, %v5231_v27  ;;  %v3394_v29 = vmul.f32 0.044715, %v3376_v43 }
 0x971   :  { %4350 = vtanh.f32 %v3422_v50  ;;  %v3399_v33 = vmul.f32 %v3391_v14, %v5235_v58  ;;  %v3392_v42 = vmul.f32 0.044715, %v3368_v44  ;;  %v3379_v35 = vmul.f32 0.5, %v5208_v56 }
 0x972   :  { %4352 = vtanh.f32 %v3420_v41  ;;  %v3409_v45 = vmul.f32 %v3401_v37, %v5231_v27  ;;  %v3402_v6 = vmul.f32 %v3394_v29, %v3376_v43  ;;  %v3380_v13 = vmul.f32 0.5, %v5216_v10 }
 0x973   :  { %v3407_v28 = vmul.f32 %v3399_v33, %v5235_v58  ;;  %v3400_v60 = vmul.f32 %v3392_v42, %v3368_v44  ;;  %v3385_v10 = vmul.f32 0.5, %v5231_v27  ;;  %v3386_v14 = vmul.f32 0.5, %v3376_v43 }
 0x974   :  { %v3417_v40 = vadd.f32 %v3409_v45, %v5231_v27  ;;  %v3410_v24 = vmul.f32 %v3402_v6, %v3376_v43  ;;  %v3383_v37 = vmul.f32 0.5, %v5235_v58  ;;  %v3384_v29 = vmul.f32 0.5, %v3368_v44 }
 0x975   :  { %v3415_v34 = vadd.f32 %v3407_v28, %v5235_v58  ;;  %v3408_v17 = vmul.f32 %v3400_v60, %v3368_v44 }
 0x976   :  { %v3425_v47 = vmul.f32 0.7978846, %v3417_v40  ;;  %v3418_v38 = vadd.f32 %v3410_v24, %v3376_v43  ;;  %v3483_v24 = vpop.permute.xlu0 %3482 }
 0x977   :  { %v3423_v23 = vmul.f32 0.7978846, %v3415_v34  ;;  %v3416_v55 = vadd.f32 %v3408_v17, %v3368_v44 }
 0x978   :  { %4354 = vtanh.f32 %v3425_v47  ;;  %v3426_v11 = vmul.f32 0.7978846, %v3418_v38 }
 0x979   :  { %v4347_v4 = vpop.eup %4346  ;;  %4356 = vtanh.f32 %v3423_v23  ;;  %v3424_v1 = vmul.f32 0.7978846, %v3416_v55 }
 0x97a   :  { %v4349_v19 = vpop.eup %4348  ;;  %v3437_v61 = vadd.f32 1.0, %v4347_v4  ;;  %4358 = vtanh.f32 %v3426_v11 }
 0x97b   :  { %v4351_v51 = vpop.eup %4350  ;;  %4360 = vtanh.f32 %v3424_v1  ;;  %v3435_v5 = vadd.f32 1.0, %v4349_v19 }
 0x97c   :  { %v4353_v16 = vpop.eup %4352  ;;  %v3438_v26 = vadd.f32 1.0, %v4351_v51  ;;  %v3445_v36 = vmul.f32 %v3437_v61, %v3381_v48 }
 0x97d   :  { %v3436_v25 = vadd.f32 1.0, %v4353_v16  ;;  %v3443_v49 = vmul.f32 %v3435_v5, %v3379_v35 }
 0x97e   :  { %v3446_v2 = vmul.f32 %v3438_v26, %v3382_v0 }
 0x97f   :  { %v3444_v18 = vmul.f32 %v3436_v25, %v3380_v13 }
 0x980   :  { %v3452_v31 = vpack.c.bf16 %v3446_v2, %v3445_v36 }
 0x981   :  { %v3451_v63 = vpack.c.bf16 %v3444_v18, %v3443_v49 }
 0x982   :  { %v4355_v32 = vpop.eup %4354 }
 0x983   :  { %v4357_v3 = vpop.eup %4356  ;;  %4198 = vmatprep.mubr.msk.bf16.mxu1 %vm3485_vm4, %v3451_v63  ;;  %v3441_v22 = vadd.f32 1.0, %v4355_v32 }
 0x984   :  { %v4359_v50 = vpop.eup %4358  ;;  %4199 = vmatmul.mubr.msk.bf16.vlgmr.msra.gmra.mrb[44].mxu1 %vm3485_vm4, %v3452_v31  ;;  %v3439_v54 = vadd.f32 1.0, %v4357_v3 }
 0x985   :  { %v4361_v56 = vpop.eup %4360  ;;  %v3442_v41 = vadd.f32 1.0, %v4359_v50  ;;  %v3449_v42 = vmul.f32 %v3441_v22, %v3385_v10 }
 0x986   :  { %v3440_v33 = vadd.f32 1.0, %v4361_v56  ;;  %v3447_v6 = vmul.f32 %v3439_v54, %v3383_v37 }
 0x987   :  { %v3450_v45 = vmul.f32 %v3442_v41, %v3386_v14 }
 0x988   :  { %v3448_v28 = vmul.f32 %v3440_v33, %v3384_v29 }
 0x989   :  { %v3454_v60 = vpack.c.bf16 %v3450_v45, %v3449_v42 }
 0x98a   :  { %v3453_v40 = vpack.c.bf16 %v3448_v28, %v3447_v6 }
 0x98c   :  { %4202 = vmatprep.mubr.msk.bf16.mxu1 %vm3485_vm4, %v3453_v40 }
 0x98d   :  { %4203 = vmatmul.mubr.msk.bf16.gmra.mrb[48].mxu1 %vm3485_vm4, %v3454_v60 }
 0xa57   :  { %v4200_v34 = vpop.f32.mrb[44].mxu1 }
 0xa58   :  { %v3532_v17 = vpop.f32.mrb[45].mxu1  ;;  %v3541_v27 = vadd.f32 %v4200_v34, %v3483_v24 }
 0xa59   :  { %v3533_v43 = vadd.f32 %v3532_v17, %v3483_v24  ;;  %v4201_v47 = vpop.f32.mrb[46].mxu1 }
 0xa5a   :  { %v3535_v38 = vpop.f32.mrb[47].mxu1  ;;  %v3565_v58 = vadd.f32 %v3541_v27, %v5155_v12  ;;  %v3544_v55 = vadd.f32 %v4201_v47, %v3483_v24 }
 0xa5b   :  { %v3536_v44 = vadd.f32 %v3535_v38, %v3483_v24  ;;  %v3563_v23 = vadd.f32 %v3533_v43, %v5160_v39 }
 0xa5c   :  { %v3577_v11 = vsel %vm35_vm0, %v3565_v58, 0.0  ;;  %v3566_v19 = vadd.f32 %v3544_v55, %v5157_v8 }
 0xa5d   :  { %v3564_v4 = vadd.f32 %v3536_v44, %v5162_v62  ;;  %3578 = vadd.xlane.f32.xlu0 %v3577_v11  ;;  %v3571_v51 = vsel %vm35_vm0, %v3563_v23, 0.0 }
 0xa5e   :  { %v3580_v62 = vsel %vm35_vm0, %v3566_v19, 0.0 }
 0xa5f   :  { %v3574_v1 = vsel %vm35_vm0, %v3564_v4, 0.0 }
 0xa60   :  { %v4204_v61 = vpop.f32.mrb[48].mxu1  ;;  %3575 = vadd.xlane.f32.xlu1 %v3574_v1 }
 0xa61   :  { %v3548_v5 = vpop.f32.mrb[49].mxu1  ;;  %3572 = vadd.xlane.f32.xlu0 %v3571_v51  ;;  %v3557_v12 = vadd.f32 %v4204_v61, %v3483_v24 }
 0xa62   :  { %v3549_v16 = vadd.f32 %v3548_v5, %v3483_v24  ;;  %v4205_v48 = vpop.f32.mrb[50].mxu1 }
 0xa63   :  { %v3551_v39 = vpop.f32.mrb[51].mxu1  ;;  %v3560_v26 = vadd.f32 %v4205_v48, %v3483_v24  ;;  %v3569_v13 = vadd.f32 %v3557_v12, %v5175_v21 }
 0xa64   :  { %v3567_v0 = vadd.f32 %v3549_v16, %v5179_v7  ;;  %v3552_v35 = vadd.f32 %v3551_v39, %v3483_v24 }
 0xa65   :  { %3581 = vadd.xlane.f32.xlu0 %v3580_v62  ;;  %v3570_v36 = vadd.f32 %v3560_v26, %v5177_v15  ;;  %v3589_v49 = vsel %vm35_vm0, %v3569_v13, 0.0 }
 0xa66   :  { %v3568_v8 = vadd.f32 %v3552_v35, %v5173_v52  ;;  %v3583_v25 = vsel %vm35_vm0, %v3567_v0, 0.0 }
 0xa67   :  { %3584 = vadd.xlane.f32.xlu1 %v3583_v25  ;;  %v3592_v7 = vsel %vm35_vm0, %v3570_v36, 0.0 }
 0xa68   :  { %v3586_v2 = vsel %vm35_vm0, %v3568_v8, 0.0 }
 0xa69   :  { %3587 = vadd.xlane.f32.xlu0 %v3586_v2 }
 0xa6b   :  { %3590 = vadd.xlane.f32.xlu1 %v3589_v49 }
 0xa6d   :  { %3593 = vadd.xlane.f32.xlu0 %v3592_v7 }
 0xaea   :  { %v3579_v18 = vpop.xlane.xlu0 %3578 }
 0xaeb   :  { %v3597_v31 = vmul.f32 0.03125, %v3579_v18 }
 0xaed   :  { %v5274_v63 = vsub.f32 %v3565_v58, %v3597_v31  ;;  %v3576_v21 = vpop.xlane.xlu1 %3575 }
 0xaee   :  { %v3596_v52 = vmul.f32 0.03125, %v3576_v21  ;;  %v3573_v32 = vpop.xlane.xlu0 %3572 }
 0xaef   :  { %v3595_v3 = vmul.f32 0.03125, %v3573_v32  ;;  %v3613_v15 = vmul.f32 %v5274_v63, %v5274_v63 }
 0xaf0   :  { %v5278_v22 = vsub.f32 %v3564_v4, %v3596_v52 }
 0xaf1   :  { %v5280_v50 = vsub.f32 %v3563_v23, %v3595_v3  ;;  %v3625_v54 = vsel %vm35_vm0, %v3613_v15, 0.0 }
 0xaf2   :  { %3626 = vadd.xlane.f32.xlu0 %v3625_v54  ;;  %v3582_v56 = vpop.xlane.xlu0 %3581  ;;  %v3612_v33 = vmul.f32 %v5278_v22, %v5278_v22 }
 0xaf3   :  { %v3598_v10 = vmul.f32 0.03125, %v3582_v56  ;;  %v3611_v14 = vmul.f32 %v5280_v50, %v5280_v50 }
 0xaf4   :  { %v3585_v41 = vpop.xlane.xlu1 %3584  ;;  %v3622_v34 = vsel %vm35_vm0, %v3612_v33, 0.0 }
 0xaf5   :  { %v5285_v37 = vsub.f32 %v3566_v19, %v3598_v10  ;;  %v3619_v29 = vsel %vm35_vm0, %v3611_v14, 0.0  ;;  %v3599_v45 = vmul.f32 0.03125, %v3585_v41 }
 0xaf6   :  { %3620 = vadd.xlane.f32.xlu1 %v3619_v29  ;;  %v3588_v42 = vpop.xlane.xlu0 %3587 }
 0xaf7   :  { %v3600_v6 = vmul.f32 0.03125, %v3588_v42  ;;  %v3614_v28 = vmul.f32 %v5285_v37, %v5285_v37  ;;  %v5296_v43 = vsub.f32 %v3567_v0, %v3599_v45 }
 0xaf8   :  { %v3591_v60 = vpop.xlane.xlu1 %3590 }
 0xaf9   :  { %v5292_v40 = vsub.f32 %v3568_v8, %v3600_v6  ;;  %v3601_v24 = vmul.f32 0.03125, %v3591_v60  ;;  %v3628_v17 = vsel %vm35_vm0, %v3614_v28, 0.0  ;;  %v3615_v1 = vmul.f32 %v5296_v43, %v5296_v43 }
 0xafa   :  { %3623 = vadd.xlane.f32.xlu1 %v3622_v34  ;;  %3629 = vadd.xlane.f32.xlu0 %v3628_v17  ;;  %v3594_v27 = vpop.xlane.xlu0 %3593 }
 0xafb   :  { %v5298_v47 = vsub.f32 %v3569_v13, %v3601_v24  ;;  %v3602_v38 = vmul.f32 0.03125, %v3594_v27  ;;  %v3616_v58 = vmul.f32 %v5292_v40, %v5292_v40  ;;  %v3631_v61 = vsel %vm35_vm0, %v3615_v1, 0.0 }
 0xafd   :  { %v5302_v44 = vsub.f32 %v3570_v36, %v3602_v38  ;;  %v3634_v23 = vsel %vm35_vm0, %v3616_v58, 0.0  ;;  %v3617_v55 = vmul.f32 %v5298_v47, %v5298_v47 }
 0xafe   :  { %3635 = vadd.xlane.f32.xlu0 %v3634_v23 }
 0xaff   :  { %v3637_v11 = vsel %vm35_vm0, %v3617_v55, 0.0  ;;  %v3618_v4 = vmul.f32 %v5302_v44, %v5302_v44 }
 0xb00   :  { %3638 = vadd.xlane.f32.xlu1 %v3637_v11 }
 0xb01   :  { %v3640_v19 = vsel %vm35_vm0, %v3618_v4, 0.0 }
 0xb02   :  { %3641 = vadd.xlane.f32.xlu0 %v3640_v19 }
 0xb04   :  { %3632 = vadd.xlane.f32.xlu1 %v3631_v61 }
 0xb15   :  { %3683 = vrot.lane.b32.xlu1 %v5196_v30, %s4383_s6 }
 0xb18   :  { %3740 = vrot.lane.b32.xlu0 %v5030_v59, %s4387_s12 }
 0xb19   :  { %3742 = vrot.lane.b32.xlu1 %v5042_v53, %s4387_s12 }
 0xb1d   :  { %3746 = vrot.lane.b32.xlu1 %v5196_v30, %s4389_s20 }
 0xb7f   :  { %v3627_v51 = vpop.xlane.xlu0 %3626 }
 0xb80   :  { %v3645_v5 = vmul.f32 0.03125, %v3627_v51 }
 0xb82   :  { %v3653_v12 = vadd.f32 1e-12, %v3645_v5 }
 0xb83   :  { %v3621_v16 = vpop.xlane.xlu1 %3620 }
 0xb84   :  { %v3643_v48 = vmul.f32 0.03125, %v3621_v16  ;;  %4362 = vrsqrt.f32 %v3653_v12 }
 0xb86   :  { %v3651_v39 = vadd.f32 1e-12, %v3643_v48 }
 0xb87   :  { %v3624_v0 = vpop.xlane.xlu1 %3623  ;;  %v3630_v26 = vpop.xlane.xlu0 %3629 }
 0xb88   :  { %4364 = vrsqrt.f32 %v3651_v39  ;;  %v3644_v35 = vmul.f32 0.03125, %v3624_v0  ;;  %v3646_v62 = vmul.f32 0.03125, %v3630_v26 }
 0xb8a   :  { %v3652_v13 = vadd.f32 1e-12, %v3644_v35  ;;  %v3654_v59 = vadd.f32 1e-12, %v3646_v62 }
 0xb8b   :  { %v3636_v8 = vpop.xlane.xlu0 %3635 }
 0xb8c   :  { %4366 = vrsqrt.f32 %v3652_v13  ;;  %v3648_v53 = vmul.f32 0.03125, %v3636_v8 }
 0xb8d   :  { %4368 = vrsqrt.f32 %v3654_v59  ;;  %v3639_v25 = vpop.xlane.xlu1 %3638 }
 0xb8e   :  { %v3656_v36 = vadd.f32 1e-12, %v3648_v53  ;;  %v3649_v2 = vmul.f32 0.03125, %v3639_v25  ;;  %v4363_v31 = vpop.eup %4362 }
 0xb8f   :  { %v3642_v49 = vpop.xlane.xlu0 %3641  ;;  %v3669_v10 = vmul.f32 %v4363_v31, %v5274_v63 }
 0xb90   :  { %4370 = vrsqrt.f32 %v3656_v36  ;;  %v3657_v7 = vadd.f32 1e-12, %v3649_v2  ;;  %v3650_v18 = vmul.f32 0.03125, %v3642_v49 }
 0xb91   :  { %v3633_v21 = vpop.xlane.xlu1 %3632  ;;  %v3677_v6 = vmul.f32 %v3669_v10, %v5196_v30 }
 0xb92   :  { %v4365_v52 = vpop.eup %4364  ;;  %4372 = vrsqrt.f32 %v3657_v7  ;;  %v3658_v32 = vadd.f32 1e-12, %v3650_v18  ;;  %v3647_v3 = vmul.f32 0.03125, %v3633_v21 }
 0xb93   :  { %v3741_v15 = vpop.permute.xlu0 %3740  ;;  %v3667_v54 = vmul.f32 %v4365_v52, %v5280_v50 }
 0xb94   :  { %4374 = vrsqrt.f32 %v3658_v32  ;;  %v3655_v56 = vadd.f32 1e-12, %v3647_v3  ;;  %4207 = vmatpush3.bf16.msra.mxu0 %v3741_v15 }
 0xb95   :  { %v3684_v14 = vpop.permute.xlu1 %3683  ;;  %4208 = vmatprep.subr.bf16.mxu0 %v4385_v9  ;;  %v3675_v42 = vmul.f32 %v3667_v54, %v5196_v30 }
 0xb96   :  { %v4367_v41 = vpop.eup %4366  ;;  %4376 = vrsqrt.f32 %v3655_v56  ;;  %v3688_v34 = vadd.f32 %v3684_v14, %v3677_v6 }
 0xb97   :  { %v4369_v29 = vpop.eup %4368  ;;  %v3668_v33 = vmul.f32 %v4367_v41, %v5278_v22  ;;  %v3686_v27 = vadd.f32 %v3684_v14, %v3675_v42 }
 0xb98   :  { %v3670_v45 = vmul.f32 %v4369_v29, %v5285_v37  ;;  %v3696_v4 = vpack.c.bf16 %v3688_v34, %v3688_v34 }
 0xb99   :  { %v3676_v50 = vmul.f32 %v3668_v33, %v5196_v30  ;;  %v3743_v28 = vpop.permute.xlu1 %3742 }
 0xb9a   :  { %v4371_v60 = vpop.eup %4370  ;;  %v3678_v63 = vmul.f32 %v3670_v45, %v5196_v30  ;;  %4209 = vmatpush3.bf16.msra.mxu0 %v3743_v28  ;;  %v3712_v0 = vunpack.c.l.b16 %v3696_v4 }
 0xb9b   :  { %v3672_v9 = vmul.f32 %v4371_v60, %v5292_v40  ;;  %v3687_v24 = vadd.f32 %v3684_v14, %v3676_v50  ;;  %v3694_v40 = vpack.c.bf16 %v3686_v27, %v3686_v27 }
 0xb9c   :  { %v4373_v17 = vpop.eup %4372  ;;  %v3689_v23 = vadd.f32 %v3684_v14, %v3678_v63  ;;  %v3721_v25 = vrot.slane %v3712_v0, 6  ;;  %v3812_v63 = vsub.s32 4, %v4488_v57 }
 0xb9d   :  { %v3680_v22 = vmul.f32 %v3672_v9, %v5196_v30  ;;  %v3673_v38 = vmul.f32 %v4373_v17, %v5298_v47  ;;  %v3695_v37 = vpack.c.bf16 %v3687_v24, %v3687_v24  ;;  %v3710_v35 = vunpack.c.l.b16 %v3694_v40 }
 0xb9e   :  { %v4375_v58 = vpop.eup %4374  ;;  %v3697_v16 = vpack.c.bf16 %v3689_v23, %v3689_v23  ;;  %v3813_v17 = vrot.slane %v5193_v20, %v3812_v63 }
 0xb9f   :  { %v3681_v55 = vmul.f32 %v3673_v38, %v5196_v30  ;;  %v3674_v11 = vmul.f32 %v4375_v58, %v5302_v44  ;;  %v3711_v1 = vunpack.c.l.b16 %v3695_v37  ;;  %v3691_v61 = vadd.f32 %v3684_v14, %v3680_v22 }
 0xba0   :  { %v4377_v19 = vpop.eup %4376  ;;  %v3713_v59 = vunpack.c.l.b16 %v3697_v16 }
 0xba1   :  { %v3682_v51 = vmul.f32 %v3674_v11, %v5196_v30  ;;  %v3671_v5 = vmul.f32 %v4377_v19, %v5296_v43  ;;  %v3692_v12 = vadd.f32 %v3684_v14, %v3681_v55  ;;  %v3718_v48 = vrot.slane %v3711_v1, 7 }
 0xba2   :  { %v3699_v26 = vpack.c.bf16 %v3691_v61, %v3691_v61 }
 0xba3   :  { %v3679_v47 = vmul.f32 %v3671_v5, %v5196_v30  ;;  %v3693_v39 = vadd.f32 %v3684_v14, %v3682_v51  ;;  %v3700_v62 = vpack.c.bf16 %v3692_v12, %v3692_v12  ;;  %v3720_v8 = vsel %vm3719_vm5, %v3718_v48, %v3710_v35 }
 0xba4   :  { %v3715_v36 = vunpack.c.l.b16 %v3699_v26  ;;  %v3723_v49 = vsel %vm3722_vm6, %v3721_v25, %v3720_v8  ;;  %v3724_v30 = vrot.slane %v3713_v59, 5 }
 0xba5   :  { %v3690_v44 = vadd.f32 %v3684_v14, %v3679_v47  ;;  %v3701_v13 = vpack.c.bf16 %v3693_v39, %v3693_v39  ;;  %v3716_v2 = vunpack.c.l.b16 %v3700_v62  ;;  %v3747_v14 = vpop.permute.xlu1 %3746 }
 0xba6   :  { %v3726_v31 = vsel %vm3725_vm7, %v3724_v30, %v3723_v49  ;;  %v3730_v21 = vrot.slane %v3715_v36, 3 }
 0xba7   :  { %v3698_v53 = vpack.c.bf16 %v3690_v44, %v3690_v44  ;;  %v3717_v7 = vunpack.c.l.b16 %v3701_v13  ;;  %v3733_v52 = vrot.slane %v3716_v2, 2 }
 0xba9   :  { %v3714_v43 = vunpack.c.l.b16 %v3698_v53  ;;  %v3736_v3 = vrot.slane %v3717_v7, 1 }
 0xbab   :  { %v3727_v18 = vrot.slane %v3714_v43, 4 }
 0xbad   :  { %v3729_v32 = vsel %vm3728_vm8, %v3727_v18, %v3726_v31 }
 0xbae   :  { %v3732_v15 = vsel %vm3731_vm9, %v3730_v21, %v3729_v32 }
 0xbaf   :  { %v3735_v54 = vsel %vm3734_vm10, %v3733_v52, %v3732_v15 }
 0xbb0   :  { %v3738_v56 = vsel %vm3737_vm11, %v3736_v3, %v3735_v54 }
 0xbb1   :  { %v3739_v10 = vpack.c.b16 %v3738_v56, %v3738_v56 }
 0xbb3   :  { %4211 = vmatmul.mubr.msk.bf16.vlgmr.msra.gmra.mrb[44].mxu0 %vm35_vm0, %v3739_v10 }
 0xc86   :  { %v3786_v41 = vpop.f32.mrb[44].mxu0 }
 0xc87   :  { %v3787_v29 = vadd.f32 %v3786_v41, %v3747_v14  ;;  %v4212_v33 = vpop.f32.mrb[45].mxu0 }
 0xc88   :  { %v3789_v42 = vpop.f32.mrb[46].mxu0 }
 0xc89   :  { %4378 = vtanh.f32 %v3787_v29  ;;  %v4213_v45 = vpop.f32.mrb[47].mxu0 }
 0xc93   :  { %v4379_v6 = vpop.eup %4378 }
 0xc94   :  { %v3798_v50 = vrot.slane %v4379_v6, 4  ;;  %v3794_v28 = vrot.slane %v4379_v6, 2  ;;  %v3802_v60 = vrot.slane %v4379_v6, 6 }
 0xc96   :  { %3799 = vrot.lane.b32.xlu0 %v3798_v50, %s4387_s12  ;;  %3795 = vrot.lane.b32.xlu1 %v3794_v28, %s4389_s20 }
 0xc9a   :  { %3803 = vrot.lane.b32.xlu1 %v3802_v60, %s4383_s6 }
 0xd08   :  { %v3796_v9 = vpop.permute.xlu1 %3795  ;;  %v3800_v24 = vpop.permute.xlu0 %3799 }
 0xd09   :  { %v3806_v34 = vsel %vm35_vm0, %v4379_v6, %v3796_v9 }
 0xd0a   :  { %v3807_v27 = vsel %vm3485_vm4, %v3806_v34, %v3800_v24 }
 0xd0c   :  { %v3804_v22 = vpop.permute.xlu1 %3803 }
 0xd0d   :  { %v3809_v38 = vsel %vm3808_vm12, %v3807_v27, %v3804_v22 }
 0xd0e   :  { %v3814_v37 = vmul.f32 %v3813_v17, %v3809_v38 }
 0xd10   :  { %v3816_v58 = vsel %vm3815_vm13, %v3814_v37, 0.0 }
 0xd11   :  { %3817 = vadd.xlane.f32.xlu0 %v3816_v58 }
 0xd9e   :  { %v3818_v23 = vpop.xlane.xlu0 %3817 }
 0xd9f   :  { %v3819_v55 = vadd.f32 %v3818_v23, %v5202_v46 }
 0xda1   :  { %3821 = vrot.lane.b32.xlu1 %v3819_v55, %s4387_s12 }
 0xe13   :  { %v3822_v57 = vpop.permute.xlu1 %3821 }
 0xe14   :  { %3825 = vst.msk [vmem:[%s5356_s4] sm:$0x3] %vm3824_vm14, %v3822_v57 }

</bundles_post_ra>
